<compile_context>
chip_gen: v5e
topology: v5e:2x2
jax: 0.10.0
libtpu: 0.0.40
codegen_flags: <defaults>
</compile_context>

<pallas_src>
import numpy as np
import jax
import jax.numpy as jnp
from jax.experimental import pallas as pl
from jax.experimental.pallas import tpu as pltpu

# ---------------- configuration (matches GNNEncoder __init__ args) ------------
NODES_PER_GRAPH = 32
EDGES_PER_GRAPH = 64
NUM_GRAPHS      = 16                                   # graphs per pallas_call
GRAPHS_PER_STEP = 8                                    # block-diagonal group size
TILE_M          = GRAPHS_PER_STEP * NODES_PER_GRAPH    # 256 node rows / grid step
NUM_STEPS       = NUM_GRAPHS // GRAPHS_PER_STEP        # grid extent (parallel)
TOTAL_NODES     = NUM_GRAPHS * NODES_PER_GRAPH

INPUT_DIM   = 16
HIDDEN_DIMS = (32, 64)          # gnn_hidden_dims
LATENT_DIM  = 8
IS_VARIATIONAL = True
LOG_VAR_MIN = -10.0
LOG_VAR_MAX = 10.0
BN_EPS      = 1e-5

PAD     = 128                   # lane-dense padding of every feature dim
OUT_DIM = 2 * LATENT_DIM        # [mu | logvar]


# ------------------------------ Pallas kernel ---------------------------------
def gnn_encoder_kernel(adj_ref, x_ref, w_ref, b_ref, out_ref):
    # adj_ref: (1, TILE_M, TILE_M) bf16  block-diagonal D^-1/2 (A+I) D^-1/2
    # x_ref  : (TILE_M, PAD) bf16        zero-padded node features
    # w_ref  : (3, PAD, PAD) bf16        [w1*s1 | w2*s2 | wf] zero-padded (resident)
    # b_ref  : (3, PAD) f32              [b1*s1+t1 | b2*s2+t2 | bf] zero-padded
    # out_ref: (TILE_M, PAD) f32         [mu | clamped logvar | 0...]
    adj = adj_ref[0]

    # ---- GNN layer 1: GCNConv (BN eval folded) -> ReLU (dropout = identity)
    h = jnp.dot(x_ref[...], w_ref[0], preferred_element_type=jnp.float32)
    h = jnp.dot(adj, h.astype(jnp.bfloat16), preferred_element_type=jnp.float32)
    h = jnp.maximum(h + b_ref[0:1, :], 0.0).astype(jnp.bfloat16)   # one cast / interm.

    # ---- GNN layer 2
    h = jnp.dot(h, w_ref[1], preferred_element_type=jnp.float32)
    h = jnp.dot(adj, h.astype(jnp.bfloat16), preferred_element_type=jnp.float32)
    h = jnp.maximum(h + b_ref[1:2, :], 0.0).astype(jnp.bfloat16)

    # ---- final projection -> [mu | logvar]; clamp only the logvar lanes
    proj = jnp.dot(h, w_ref[2], preferred_element_type=jnp.float32) + b_ref[2:3, :]
    col = jax.lax.broadcasted_iota(jnp.int32, proj.shape, 1)
    is_logvar = jnp.logical_and(col >= LATENT_DIM, col < OUT_DIM)
    out_ref[...] = jnp.where(is_logvar,
                             jnp.clip(proj, LOG_VAR_MIN, LOG_VAR_MAX),
                             proj)


# ----------------------- one-time preprocessing (not hot path) ----------------
def _pad2(a, rows, cols):
    return jnp.zeros((rows, cols), jnp.float32).at[:a.shape[0], :a.shape[1]].set(a)


def prepare_params(params):
    """Fold BatchNorm eval affine into GCN weights/biases, pad & stack. Run once."""
    w1_eff = params["w1"] * params["s1"]
    b1_eff = params["b1"] * params["s1"] + params["t1"]
    w2_eff = params["w2"] * params["s2"]
    b2_eff = params["b2"] * params["s2"] + params["t2"]
    w_stack = jnp.stack([_pad2(w1_eff, PAD, PAD),
                         _pad2(w2_eff, PAD, PAD),
                         _pad2(params["wf"], PAD, PAD)]).astype(jnp.bfloat16)
    b_stack = jnp.stack([_pad2(b1_eff, 1, PAD)[0],
                         _pad2(b2_eff, 1, PAD)[0],
                         _pad2(params["bf"], 1, PAD)[0]])            # (3, PAD) f32
    return w_stack, b_stack


def prepare_graph_batch(adjs, xs):
    """Pack per-graph adjacencies block-diagonally per grid step; pad features. Run once."""
    B, N, _ = adjs.shape
    adjs_np = np.asarray(adjs, np.float32)
    blocks = np.zeros((NUM_STEPS, TILE_M, TILE_M), np.float32)
    for s in range(NUM_STEPS):
        for j in range(GRAPHS_PER_STEP):
            g = s * GRAPHS_PER_STEP + j
            blocks[s, j * N:(j + 1) * N, j * N:(j + 1) * N] = adjs_np[g]
    adj_blocks = jnp.asarray(blocks).astype(jnp.bfloat16)            # (S, M, M) bf16
    x_flat = xs.reshape(B * N, -1)
    x_pad = _pad2(x_flat, TOTAL_NODES, PAD).astype(jnp.bfloat16)     # (B*N, PAD) bf16
    return adj_blocks, x_pad


# ------------------------------ fused forward ---------------------------------
@jax.jit
def gnn_encoder_forward(adj_blocks, x_pad, w_stack, b_stack):
    """Fused GNNEncoder forward (eval). Returns (sampled_z, mu, log_var) per node."""
    flops = NUM_STEPS * (2 * TILE_M * PAD * PAD * 3 + 2 * TILE_M * TILE_M * PAD * 2)
    bytes_accessed = (adj_blocks.size * 2 + x_pad.size * 2 + w_stack.size * 2
                      + b_stack.size * 4 + TOTAL_NODES * PAD * 4)

    out = pl.pallas_call(
        gnn_encoder_kernel,
        grid=(NUM_STEPS,),
        in_specs=[
            pl.BlockSpec((1, TILE_M, TILE_M), lambda g: (g, 0, 0)),   # per-step adj
            pl.BlockSpec((TILE_M, PAD), lambda g: (g, 0)),            # per-step nodes
            pl.BlockSpec((3, PAD, PAD), lambda g: (0, 0, 0)),         # weights resident
            pl.BlockSpec((3, PAD), lambda g: (0, 0)),                 # biases resident
        ],
        out_specs=pl.BlockSpec((TILE_M, PAD), lambda g: (g, 0)),
        out_shape=jax.ShapeDtypeStruct((TOTAL_NODES, PAD), jnp.float32),
        compiler_params=pltpu.CompilerParams(
            dimension_semantics=("parallel",)),                       # v7x: 2 TCs split
        cost_estimate=pl.CostEstimate(flops=flops, transcendentals=0,
                                      bytes_accessed=bytes_accessed),
    )(adj_blocks, x_pad, w_stack, b_stack)

    mu      = out[:, :LATENT_DIM]
    log_var = out[:, LATENT_DIM:OUT_DIM]
    z       = mu                                  # eval: reparameterize() == mu
    return z, mu, log_var


# ------------------------------- glue (JAX) ------------------------------------
def build_normalized_adjacency(edge_index, num_nodes):
    """Dense  D^-1/2 (A + I) D^-1/2  matching PyG GCNConv normalization."""
    src, dst = edge_index[0], edge_index[1]
    A = jnp.zeros((num_nodes, num_nodes), jnp.float32)
    A = A.at[dst, src].add(1.0)                       # message j -> i in A[i, j]
    A = A + jnp.eye(num_nodes, dtype=jnp.float32)     # add self loops
    deg = A.sum(axis=1)
    dinv = jnp.where(deg > 0, jax.lax.rsqrt(deg), 0.0)
    return dinv[:, None] * A * dinv[None, :]


def init_params(key):
    k = jax.random.split(key, 6)
    dims = (INPUT_DIM,) + HIDDEN_DIMS
    out_dim = 2 * LATENT_DIM if IS_VARIATIONAL else LATENT_DIM

    def lin(key, i, o):
        return 0.1 * jax.random.normal(key, (i, o), jnp.float32)

    p = {}
    p["w1"] = lin(k[0], dims[0], dims[1])
    p["b1"] = jnp.zeros((1, dims[1]), jnp.float32)
    p["w2"] = lin(k[1], dims[1], dims[2])
    p["b2"] = jnp.zeros((1, dims[2]), jnp.float32)
    # BatchNorm1d eval affine (init: gamma=1, beta=0, running_mean=0, running_var=1)
    for name, h in (("1", dims[1]), ("2", dims[2])):
        gamma = jnp.ones((1, h), jnp.float32)
        beta  = jnp.zeros((1, h), jnp.float32)
        rmean = jnp.zeros((1, h), jnp.float32)
        rvar  = jnp.ones((1, h), jnp.float32)
        scale = gamma / jnp.sqrt(rvar + BN_EPS)
        shift = beta - rmean * scale
        p["s" + name] = scale
        p["t" + name] = shift
    p["wf"] = lin(k[2], dims[2], out_dim)
    p["bf"] = 0.01 * jax.random.normal(k[3], (1, out_dim), jnp.float32)
    return p


def reference_forward(adjs, xs, p):
    """Pure-JAX per-graph reference mirroring the kernel's bf16-operand / f32-accum math."""
    bf16 = jnp.bfloat16
    w1_eff = p["w1"] * p["s1"]
    b1_eff = p["b1"] * p["s1"] + p["t1"]
    w2_eff = p["w2"] * p["s2"]
    b2_eff = p["b2"] * p["s2"] + p["t2"]

    def mm(a, b):
        return jnp.dot(a.astype(bf16), b.astype(bf16),
                       preferred_element_type=jnp.float32)

    mus, lvs = [], []
    for g in range(adjs.shape[0]):
        adj, x = adjs[g], xs[g]
        h = jnp.maximum(mm(adj, mm(x, w1_eff)) + b1_eff, 0.0)
        h = jnp.maximum(mm(adj, mm(h, w2_eff)) + b2_eff, 0.0)
        proj = mm(h, p["wf"]) + p["bf"]
        mus.append(proj[:, :LATENT_DIM])
        lvs.append(jnp.clip(proj[:, LATENT_DIM:], LOG_VAR_MIN, LOG_VAR_MAX))
    mu = jnp.concatenate(mus, axis=0)
    lv = jnp.concatenate(lvs, axis=0)
    return mu, mu, lv


if __name__ == "__main__":
    key = jax.random.PRNGKey(0)
    k_feat, k_edge, k_param = jax.random.split(key, 3)

    # ---- synthetic batch of NUM_GRAPHS graphs: node features + random edge_index
    xs = jax.random.normal(k_feat, (NUM_GRAPHS, NODES_PER_GRAPH, INPUT_DIM), jnp.float32)
    edge_keys = jax.random.split(k_edge, NUM_GRAPHS)
    adjs = []
    for g in range(NUM_GRAPHS):
        ks, kd = jax.random.split(edge_keys[g])
        edge_index = jnp.stack([
            jax.random.randint(ks, (EDGES_PER_GRAPH,), 0, NODES_PER_GRAPH),
            jax.random.randint(kd, (EDGES_PER_GRAPH,), 0, NODES_PER_GRAPH),
        ]).astype(jnp.int32)
        adjs.append(build_normalized_adjacency(edge_index, NODES_PER_GRAPH))
    adjs = jnp.stack(adjs)                                   # (B, N, N) f32

    params = init_params(k_param)

    # ---- one-time preprocessing (hoisted out of the per-call hot path)
    w_stack, b_stack = prepare_params(params)
    adj_blocks, x_pad = prepare_graph_batch(adjs, xs)

    # ---- fused kernel forward
    z, mu, log_var = gnn_encoder_forward(adj_blocks, x_pad, w_stack, b_stack)
    jax.block_until_ready((z, mu, log_var))

    # ---- numerical check against pure-JAX reference
    z_ref, mu_ref, lv_ref = reference_forward(adjs, xs, params)
    assert z.shape == (TOTAL_NODES, LATENT_DIM)
    assert np.allclose(np.asarray(z), np.asarray(z_ref), atol=5e-3, rtol=5e-3)
    assert np.allclose(np.asarray(mu), np.asarray(mu_ref), atol=5e-3, rtol=5e-3)
    assert np.allclose(np.asarray(log_var), np.asarray(lv_ref), atol=5e-3, rtol=5e-3)

    print("KERNEL_OK")
</pallas_src>

<mosaic_0001>
module attributes {stable_mosaic.version = 11 : i64} {
  func.func @gnn_encoder_kernel(%arg0: i32, %arg1: memref<1x256x256xbf16, #tpu.memory_space<vmem>>, %arg2: memref<256x128xbf16, #tpu.memory_space<vmem>>, %arg3: memref<3x128x128xbf16, #tpu.memory_space<vmem>>, %arg4: memref<3x128xf32, #tpu.memory_space<vmem>>, %arg5: memref<256x128xf32, #tpu.memory_space<vmem>>) attributes {dimension_semantics = [#tpu.dimension_semantics<parallel>], iteration_bounds = array<i64: 2>, scalar_prefetch = 0 : i64, scratch_operands = 0 : i64, tpu.core_type = #tpu.core_type<tc>, window_params = [{transform_indices = @transform_0, window_bounds = array<i64: 1, 256, 256>}, {transform_indices = @transform_1, window_bounds = array<i64: 256, 128>}, {pipeline_mode = #tpu.pipeline_mode<synchronous>, transform_indices = @transform_2, window_bounds = array<i64: 3, 128, 128>}, {pipeline_mode = #tpu.pipeline_mode<synchronous>, transform_indices = @transform_3, window_bounds = array<i64: 3, 128>}, {transform_indices = @transform_4, window_bounds = array<i64: 256, 128>}]} {
    %c0 = arith.constant 0 : index
    %c0_0 = arith.constant 0 : index
    %c0_1 = arith.constant 0 : index
    %0 = vector.load %arg1[%c0, %c0_0, %c0_1] : memref<1x256x256xbf16, #tpu.memory_space<vmem>>, vector<1x256x256xbf16>
    %1 = vector.shape_cast %0 : vector<1x256x256xbf16> to vector<256x256xbf16>
    %c0_2 = arith.constant 0 : index
    %c0_3 = arith.constant 0 : index
    %2 = vector.load %arg2[%c0_2, %c0_3] : memref<256x128xbf16, #tpu.memory_space<vmem>>, vector<256x128xbf16>
    %c0_4 = arith.constant 0 : index
    %c0_5 = arith.constant 0 : index
    %c0_6 = arith.constant 0 : index
    %3 = vector.load %arg3[%c0_4, %c0_5, %c0_6] : memref<3x128x128xbf16, #tpu.memory_space<vmem>>, vector<1x128x128xbf16>
    %4 = vector.shape_cast %3 : vector<1x128x128xbf16> to vector<128x128xbf16>
    %cst = arith.constant dense<0.000000e+00> : vector<256x128xf32>
    %5 = tpu.matmul %2, %4, %cst {dimension_numbers = #tpu.dot_dimension_numbers<[1], [0], [0], [1], [0, 0, 1, 1], [], []>} : vector<256x128xbf16>, vector<128x128xbf16>, vector<256x128xf32> -> vector<256x128xf32>
    %6 = arith.truncf %5 : vector<256x128xf32> to vector<256x128xbf16>
    %cst_7 = arith.constant dense<0.000000e+00> : vector<256x128xf32>
    %7 = tpu.matmul %1, %6, %cst_7 {dimension_numbers = #tpu.dot_dimension_numbers<[1], [0], [0], [1], [0, 0, 1, 1], [], []>} : vector<256x256xbf16>, vector<256x128xbf16>, vector<256x128xf32> -> vector<256x128xf32>
    %c0_8 = arith.constant 0 : index
    %c0_9 = arith.constant 0 : index
    %8 = vector.load %arg4[%c0_8, %c0_9] : memref<3x128xf32, #tpu.memory_space<vmem>>, vector<1x128xf32>
    %9 = vector.broadcast %8 : vector<1x128xf32> to vector<256x128xf32>
    %10 = arith.addf %7, %9 : vector<256x128xf32>
    %cst_10 = arith.constant 0.000000e+00 : f32
    %11 = vector.broadcast %cst_10 : f32 to vector<256x128xf32>
    %12 = arith.maximumf %10, %11 : vector<256x128xf32>
    %13 = arith.truncf %12 : vector<256x128xf32> to vector<256x128xbf16>
    %c1 = arith.constant 1 : index
    %c0_11 = arith.constant 0 : index
    %c0_12 = arith.constant 0 : index
    %14 = vector.load %arg3[%c1, %c0_11, %c0_12] : memref<3x128x128xbf16, #tpu.memory_space<vmem>>, vector<1x128x128xbf16>
    %15 = vector.shape_cast %14 : vector<1x128x128xbf16> to vector<128x128xbf16>
    %cst_13 = arith.constant dense<0.000000e+00> : vector<256x128xf32>
    %16 = tpu.matmul %13, %15, %cst_13 {dimension_numbers = #tpu.dot_dimension_numbers<[1], [0], [0], [1], [0, 0, 1, 1], [], []>} : vector<256x128xbf16>, vector<128x128xbf16>, vector<256x128xf32> -> vector<256x128xf32>
    %17 = arith.truncf %16 : vector<256x128xf32> to vector<256x128xbf16>
    %cst_14 = arith.constant dense<0.000000e+00> : vector<256x128xf32>
    %18 = tpu.matmul %1, %17, %cst_14 {dimension_numbers = #tpu.dot_dimension_numbers<[1], [0], [0], [1], [0, 0, 1, 1], [], []>} : vector<256x256xbf16>, vector<256x128xbf16>, vector<256x128xf32> -> vector<256x128xf32>
    %c1_15 = arith.constant 1 : index
    %c0_16 = arith.constant 0 : index
    %19 = vector.load %arg4[%c1_15, %c0_16] : memref<3x128xf32, #tpu.memory_space<vmem>>, vector<1x128xf32>
    %20 = vector.broadcast %19 : vector<1x128xf32> to vector<256x128xf32>
    %21 = arith.addf %18, %20 : vector<256x128xf32>
    %cst_17 = arith.constant 0.000000e+00 : f32
    %22 = vector.broadcast %cst_17 : f32 to vector<256x128xf32>
    %23 = arith.maximumf %21, %22 : vector<256x128xf32>
    %24 = arith.truncf %23 : vector<256x128xf32> to vector<256x128xbf16>
    %c2 = arith.constant 2 : index
    %c0_18 = arith.constant 0 : index
    %c0_19 = arith.constant 0 : index
    %25 = vector.load %arg3[%c2, %c0_18, %c0_19] : memref<3x128x128xbf16, #tpu.memory_space<vmem>>, vector<1x128x128xbf16>
    %26 = vector.shape_cast %25 : vector<1x128x128xbf16> to vector<128x128xbf16>
    %cst_20 = arith.constant dense<0.000000e+00> : vector<256x128xf32>
    %27 = tpu.matmul %24, %26, %cst_20 {dimension_numbers = #tpu.dot_dimension_numbers<[1], [0], [0], [1], [0, 0, 1, 1], [], []>} : vector<256x128xbf16>, vector<128x128xbf16>, vector<256x128xf32> -> vector<256x128xf32>
    %c2_21 = arith.constant 2 : index
    %c0_22 = arith.constant 0 : index
    %28 = vector.load %arg4[%c2_21, %c0_22] : memref<3x128xf32, #tpu.memory_space<vmem>>, vector<1x128xf32>
    %29 = vector.broadcast %28 : vector<1x128xf32> to vector<256x128xf32>
    %30 = arith.addf %27, %29 : vector<256x128xf32>
    %31 = tpu.iota {dimensions = array<i32: 1>} : vector<256x128xi32>
    %c8_i32 = arith.constant 8 : i32
    %32 = vector.broadcast %c8_i32 : i32 to vector<256x128xi32>
    %33 = arith.cmpi sge, %31, %32 : vector<256x128xi32>
    %c16_i32 = arith.constant 16 : i32
    %34 = vector.broadcast %c16_i32 : i32 to vector<256x128xi32>
    %35 = arith.cmpi slt, %31, %34 : vector<256x128xi32>
    %36 = arith.andi %33, %35 : vector<256x128xi1>
    %cst_23 = arith.constant -1.000000e+01 : f32
    %cst_24 = arith.constant 1.000000e+01 : f32
    %37 = vector.broadcast %cst_23 : f32 to vector<256x128xf32>
    %38 = arith.maximumf %37, %30 : vector<256x128xf32>
    %39 = vector.broadcast %cst_24 : f32 to vector<256x128xf32>
    %40 = arith.minimumf %39, %38 : vector<256x128xf32>
    %41 = arith.select %36, %40, %30 : vector<256x128xi1>, vector<256x128xf32>
    %c0_25 = arith.constant 0 : index
    %c0_26 = arith.constant 0 : index
    %42 = vector.load %arg5[%c0_25, %c0_26] : memref<256x128xf32, #tpu.memory_space<vmem>>, vector<256x128xf32>
    tpu.vector_store %arg5[%c0_25, %c0_26], %41 {strides = array<i32>} : memref<256x128xf32, #tpu.memory_space<vmem>>, vector<256x128xf32>,
    return
  }
  func.func @transform_0(%arg0: i32) -> (i32, i32, i32) {
    %c0_i32 = arith.constant 0 : i32
    %c0_i32_0 = arith.constant 0 : i32
    %c0_i32_1 = arith.constant 0 : i32
    return %arg0, %c0_i32, %c0_i32_0 : i32, i32, i32
  }
  func.func @transform_1(%arg0: i32) -> (i32, i32) {
    %c0_i32 = arith.constant 0 : i32
    %c0_i32_0 = arith.constant 0 : i32
    return %arg0, %c0_i32 : i32, i32
  }
  func.func @transform_2(%arg0: i32) -> (i32, i32, i32) {
    %c0_i32 = arith.constant 0 : i32
    %c0_i32_0 = arith.constant 0 : i32
    %c0_i32_1 = arith.constant 0 : i32
    %c0_i32_2 = arith.constant 0 : i32
    return %c0_i32, %c0_i32_0, %c0_i32_1 : i32, i32, i32
  }
  func.func @transform_3(%arg0: i32) -> (i32, i32) {
    %c0_i32 = arith.constant 0 : i32
    %c0_i32_0 = arith.constant 0 : i32
    %c0_i32_1 = arith.constant 0 : i32
    return %c0_i32, %c0_i32_0 : i32, i32
  }
  func.func @transform_4(%arg0: i32) -> (i32, i32) {
    %c0_i32 = arith.constant 0 : i32
    %c0_i32_0 = arith.constant 0 : i32
    return %arg0, %c0_i32 : i32, i32
  }
}

</mosaic_0001>

<bundles_post_ra>
// kernel: gnn_encoder_forward.1
= control target key start
LH: loop header
LB: loop body
LE: loop exit
PB: predicated region body
PF: predicated region fallthrough
CT: control target
= control target key end

     0   :  { %s3153_s0 = inlined_call_operand.hbm [shape: bf16[2,256,256], index: 0, kind: input, shape index: {}]   ;;  %s3154_s1 = inlined_call_operand.hbm [shape: bf16[512,128], index: 1, kind: input, shape index: {}]   ;;  %s3155_s2 = inlined_call_operand.hbm [shape: bf16[3,128,128], index: 2, kind: input, shape index: {}]   ;;  %s3156_s3 = inlined_call_operand.hbm [shape: f32[3,128], index: 3, kind: input, shape index: {}]   ;;  %s3157_s4 = inlined_call_operand.vmem [shape: f32[512,128], index: 4, kind: output, shape index: {}]  }
   0x1   :  { %3164 = sst [smem:[#allocation17_spill]] %s3153_s0 }
   0x2   :  { %9 = vsyncpa [#allocation3], 0 }
   0x3   :  { %11 = vsyncpa [#allocation3 + $0x1], 0 }
   0x4   :  { %12 = vsyncpa [#allocation5], 0 }
   0x5   :  { %14 = vsyncpa [#allocation5 + $0x1], 0 }
   0x6   :  { %15 = vsyncpa [#allocation8], 0  ;;  %s2518_s15 = smov 0   ;;  %s2520_s16 = smov 0  }
   0x7   :  { %s2522_s17 = smov 0   ;;  %s2524_s18 = smov 0  }
   0x8 LB: > { %s2537_s19 = sadd.s32 4294967295, %s2485_s18   ;;  %p41_p0 = scmp.ne.s32.totalorder %s2477_s16, %s2473_s15  ;;  %s2485_s18 = sphi %s2524_s18, %s3186_s18   ;;  %s2481_s17 = sphi %s2522_s17, %s3185_s17   ;;  %s2477_s16 = sphi %s2520_s16, %s3184_s16   ;;  %s2473_s15 = sphi %s2518_s15, %s3183_s15  }
   0x9   : > { %p42_p1 = scmp.eq.s32.totalorder %s2537_s19, 0  ;;  %p1810_p2 = scmp.ge.s32.totalorder %s2485_s18, 1 }
   0xa   : > { %p146_p3 = scmp.lt.s32.totalorder %s2485_s18, 3  ;;  %s157_s23 = sshll.u32 %s3155_s2, 4  ;;  %s158_s23 = int_to_ptr.hbm [resolvable:$true] %s157_s23 }
   0xb   : > { %p2545_p4 = por %p42_p1, %p41_p0  ;;  %s2487_s25 = smov [#allocation6]  }
   0xc   : > { %p2552_p5 = pnand %p1810_p2, %p146_p3  ;;  %s159_s26 = sshll.u32 %s2487_s25, 4  ;;  %s160_s26 = int_to_ptr.vmem [resolvable:$true] %s159_s26 }
   0xd   : > { %s172_s29 = sshll.u32 %s3156_s3, 4  ;;  %s3158_s30 = smov 64   ;;  %s173_s29 = int_to_ptr.hbm [resolvable:$true] %s172_s29 }
   0xe   : > { %p2259_p6 = pneg %p2552_p5  ;;  %s3159_s5 = smov 4  }
   0xf   : > { %s2490_s6 = smov [#allocation7]   ;;  %s2567_s8 = sadd.s32 1, %s2485_s18  }
  0x10   : > { %p2260_p7 = pnand %p2259_p6, %p42_p1  ;;  %s174_s7 = sshll.u32 %s2490_s6, 4  ;;  %s175_s7 = int_to_ptr.vmem [resolvable:$true] %s174_s7 }
  0x11   : > { %s28_s9 = sadd.s32 1, %s2481_s17  ;;  %s25_s10 = ssub.s32 %s2485_s18, %s2567_s8 }
  0x12   : > { %2262 = dma.hbm_to_vmem [thread:$0]  (!%p2260_p7), %s158_s23, 3072, %s160_s26, [#allocation5], %s3158_s30, %s3158_s30, %s3159_s5  }
  0x13   : > { %2265 = dma.hbm_to_vmem [thread:$0]  (!%p2260_p7), %s173_s29, 64, %s175_s7, [#allocation8]  }
  0x14   : > { %p35_p8 = scmp.ne.s32.totalorder %s2481_s17, %s2477_s16  ;;  %p26_p9 = scmp.eq.s32.totalorder %s25_s10, 0 }
  0x15   : > { %p36_p10 = scmp.eq.s32.totalorder %s2485_s18, 0  ;;  %p2275_p11 = scmp.lt.s32.totalorder %s2485_s18, 2 }
  0x16   : > { %s2577_s11 = sand.u32 1, %s2481_s17   ;;  %s2149_s14 = sshll.u32 %s2485_s18, 8 }
  0x17   : > { %s2580_s12 = scalar_select %p26_p9, %s2481_s17, %s28_s9  }
  0x18   : > { %p37_p12 = por %p36_p10, %p35_p8  ;;  %s1814_s13 = sshll.u32 %s2577_s11, 8 }
  0x19   : > { %s3167_s0 = sld [smem:[#allocation17_spill]]  ;;  %s189_s25 = scalar_lea.vmem [#allocation2], %s1814_s13 }
  0x1a   : > { %s197_s26 = sshll.u32 %s189_s25, 4  ;;  %p2587_p13 = pnand %p2275_p11, %p37_p12  ;;  %s198_s26 = int_to_ptr.vmem [resolvable:$true] %s197_s26 }
  0x1b   : > { %s207_s28 = sand.u32 1, %s2485_s18   ;;  %s186_s29 = scalar_lea.sflag [#allocation3], %s2577_s11 }
  0x1c   : > { %p2383_p2 = pneg %p2587_p13 }
  0x1f   : > { %s194_s22 = scalar_lea.hbm %s3167_s0, %s2149_s14  ;;  %s2386_s13 = scalar_lea.hbm %s3167_s0, 512 }
  0x20   : > { %s195_s23 = sshll.u32 %s194_s22, 4  ;;  %s196_s23 = int_to_ptr.hbm [resolvable:$true] %s195_s23 }
  0x21   : > { %s2379_s6 = sshra.s32 %s196_s23, 4  ;;  %s2380_s6 = int_to_ptr.hbm [resolvable:$true] %s2379_s6 }
  0x22   : > { %s2381_s7 = scalar_lea.hbm %s2380_s6, 256  ;;  %p2387_p7 = scmp.lt.s32.totalorder %s2380_s6, %s3167_s0 }
  0x23   : > { %p2382_p0 = scmp.ne.s32.totalorder %s2380_s6, %s2381_s7  ;;  %p2388_p8 = scmp.lt.s32.totalorder %s2386_s13, %s2381_s7 }
  0x25   : > { %p2384_p3 = pnand %p2383_p2, %p2382_p0  ;;  %p2389_p9 = por %p2388_p8, %p2387_p7 }
  0x27   : > { %p2385_p6 = pneg %p2384_p3 }
  0x29   : > { %p2390_p10 = pnand %p2389_p9, %p2385_p6 }
  0x2b   : > { %2393 = shalt.err (!%p2390_p10)
}
  0x2c   : > { %s2491_s21 = smov 128   ;;  %s2492_s22 = smov 8  }
  0x2d   : > { %2269 = dma.hbm_to_vmem [thread:$0]  (!%p2587_p13), %s196_s23, 4096, %s198_s26, %s186_s29, %s2491_s21, %s2491_s21, %s2492_s22  }
  0x2e   : > { %s1817_s25 = sshll.u32 %s2577_s11, 7  ;;  %s2150_s30 = sshll.u32 %s2485_s18, 7 }
  0x2f   : > { %s216_s5 = scalar_lea.hbm %s3154_s1, %s2150_s30  ;;  %s211_s6 = scalar_lea.vmem [#allocation4], %s1817_s25 }
  0x30   : > { %s217_s14 = sshll.u32 %s216_s5, 4  ;;  %s219_s7 = sshll.u32 %s211_s6, 4  ;;  %s218_s14 = int_to_ptr.hbm [resolvable:$true] %s217_s14  ;;  %s220_s7 = int_to_ptr.vmem [resolvable:$true] %s219_s7 }
  0x31   : > { %s208_s13 = scalar_lea.sflag [#allocation5], %s207_s28  ;;  %s2409_s15 = sshra.s32 %s218_s14, 4  ;;  %s2410_s15 = int_to_ptr.hbm [resolvable:$true] %s2409_s15 }
  0x32   : > { %s2411_s0 = scalar_lea.hbm %s2410_s15, 128  ;;  %s2416_s23 = scalar_lea.hbm %s3154_s1, 256 }
  0x33   : > { %p2412_p11 = scmp.ne.s32.totalorder %s2410_s15, %s2411_s0  ;;  %p2417_p3 = scmp.lt.s32.totalorder %s2410_s15, %s3154_s1 }
  0x34   : > { %p2418_p6 = scmp.lt.s32.totalorder %s2416_s23, %s2411_s0 }
  0x35   : > { %p2414_p12 = pnand %p2412_p11, %p2383_p2 }
  0x36   : > { %p2419_p7 = por %p2418_p6, %p2417_p3 }
  0x37   : > { %p2415_p0 = pneg %p2414_p12 }
  0x39   : > { %p2420_p8 = pnand %p2419_p7, %p2415_p0 }
  0x3b   : > { %2423 = shalt.err (!%p2420_p8)
}
  0x3c   : > { %s3169_s5 = smov 4   ;;  %s3170_s28 = smov 64  }
  0x3d   : > { %2272 = dma.hbm_to_vmem [thread:$0]  (!%p2587_p13), %s218_s14, 2048, %s220_s7, %s208_s13, %s3170_s28, %s3170_s28, %s3169_s5  }
  0x3e   : > { %231 = sbr.rel (%p2552_p5) target bundleno = 1522 (0x5f2), region = 36 }
  0x43   : > { %s233_s29 = sand.u32 1, %s2477_s16  }
  0x44   : > { %s1821_s21 = sshll.u32 %s233_s29, 8  ;;  %s234_s22 = scalar_lea.sflag [#allocation3], %s233_s29 }
  0x45   : > { %s2628_s25 = scalar_lea.vmem [#allocation2], %s1821_s21 }
  0x46   : > { %2456 = dma.done.wait (%p2545_p4), %s234_s22, 4096  }
  0x47   : > { %2458 = vsyncadd (%p2545_p4), %s234_s22, 4294963200  ;;  %s243_s0 = sand.u32 1, %s2537_s19   ;;  %s1822_s27 = sshll.u32 %s233_s29, 7 }
  0x48   : > { %s244_s9 = scalar_lea.sflag [#allocation5], %s243_s0  ;;  %s2635_s10 = scalar_lea.vmem [#allocation4], %s1822_s27 }
  0x49   : > { %2460 = dma.done.wait (%p2545_p4), %s244_s9, 2048  }
  0x4a   : > { %2462 = vsyncadd (%p2545_p4), %s244_s9, 4294965248 }
  0x4b   : > { %2464 = dma.done.wait (%p42_p1), [#allocation5], 3072  }
  0x4c   : > { %2466 = vsyncadd (%p42_p1), [#allocation5], 4294964224 }
  0x4d   : > { %2468 = dma.done.wait (%p42_p1), [#allocation8], 64  }
  0x4e   : > { %2470 = vsyncadd (%p42_p1), [#allocation8], 4294967232  ;;  %v2206_v0 = vld [vmem:[#allocation6 + $0x38] sm:$0xff]  ;;  %v2205_v1 = vld [vmem:[#allocation6 + $0x30] sm:$0xff]  ;;  %s1825_s20 = sshll.u32 %s2537_s19, 5 }
  0x4f   : > { %519 = vmatpush.bf16.msra.mxu0 %v2206_v0  ;;  %2223 = vmatpush.bf16.msra.mxu3 %v2206_v0  ;;  %v2204_v2 = vld [vmem:[#allocation6 + $0x28] sm:$0xff]  ;;  %v2203_v3 = vld [vmem:[#allocation6 + $0x20] sm:$0xff]  ;;  %v2202_v4 = vld [vmem:[#allocation6 + $0x18] sm:$0xff]  ;;  %p290_p1 = scmp.lt.s32.totalorder %s1825_s20, 63 }
  0x50   : > { %v2201_v5 = vld [vmem:[#allocation6 + $0x10] sm:$0xff]  ;;  %v2200_v6 = vld [vmem:[#allocation6 + $0x8] sm:$0xff]  ;;  %v2199_v7 = vld [vmem:[#allocation6] sm:$0xff] }
  0x51   : > { %v2183_v8 = vld [vmem:[%s2635_s10] sm:$0xff]  ;;  %v2184_v10 = vld [vmem:[%s2635_s10 + $0x8] sm:$0xff]  ;;  %v2185_v12 = vld [vmem:[%s2635_s10 + $0x10] sm:$0xff]  ;;  %s3188_s20 = smov (!%p290_p1, %s1825_s20), 63 }
  0x52   : > { %v2195_v9 = vld [vmem:[%s2635_s10 + $0x60] sm:$0xff]  ;;  %v2196_v11 = vld [vmem:[%s2635_s10 + $0x68] sm:$0xff]  ;;  %v2197_v13 = vld [vmem:[%s2635_s10 + $0x70] sm:$0xff]  ;;  %s1826_s24 = sshll.u32 %s3188_s20, 3 }
  0x53   : > { %520 = vmatpush.bf16.msra.mxu0 %v2205_v1  ;;  %2224 = vmatpush.bf16.msra.mxu3 %v2205_v1  ;;  %v2186_v14 = vld [vmem:[%s2635_s10 + $0x18] sm:$0xff]  ;;  %v2187_v16 = vld [vmem:[%s2635_s10 + $0x20] sm:$0xff]  ;;  %v2188_v17 = vld [vmem:[%s2635_s10 + $0x28] sm:$0xff]  ;;  %s2998_s6 = scalar_lea.vmem %s3157_s4, %s1826_s24 }
  0x54   : > { %v2198_v15 = vld [vmem:[%s2635_s10 + $0x78] sm:$0xff]  ;;  %v2189_v18 = vld [vmem:[%s2635_s10 + $0x30] sm:$0xff]  ;;  %v2191_v20 = vld [vmem:[%s2635_s10 + $0x40] sm:$0xff] }
  0x55   : > { %v2190_v19 = vld [vmem:[%s2635_s10 + $0x38] sm:$0xff]  ;;  %v2192_v24 = vld [vmem:[%s2635_s10 + $0x48] sm:$0xff]  ;;  %v2193_v29 = vld [vmem:[%s2635_s10 + $0x50] sm:$0xff] }
  0x56   : > { %v2194_v34 = vld [vmem:[%s2635_s10 + $0x58] sm:$0xff]  ;;  %v2021_v62 = vld [vmem:[%s2628_s25 + $0xc0] sm:$0xf]  ;;  %v2176_v63 = vld [vmem:[%s2628_s25 + $0xc4] sm:$0xf0] }
  0x57   : > { %521 = vmatpush.bf16.msra.mxu0 %v2204_v2  ;;  %2225 = vmatpush.bf16.msra.mxu3 %v2204_v2  ;;  %v2675_v1 = vor.u32 %v2176_v63, %v2021_v62  ;;  %v2047_v62 = vld [vmem:[%s2628_s25 + $0xf8] sm:$0xf0]  ;;  %v1973_v63 = vld [vmem:[%s2628_s25 + $0x60] sm:$0xf] }
  0x5b   : > { %522 = vmatpush.bf16.msra.mxu0 %v2203_v3  ;;  %2226 = vmatpush.bf16.msra.mxu3 %v2203_v3 }
  0x5f   : > { %523 = vmatpush.bf16.msra.mxu0 %v2202_v4  ;;  %2227 = vmatpush.bf16.msra.mxu3 %v2202_v4  ;;  %v2029_v4 = vld [vmem:[%s2628_s25 + $0xd0] sm:$0xf] }
  0x63   : > { %524 = vmatpush.bf16.msra.mxu0 %v2201_v5  ;;  %2228 = vmatpush.bf16.msra.mxu3 %v2201_v5  ;;  %v2178_v5 = vld [vmem:[%s2628_s25 + $0xd4] sm:$0xf0] }
  0x67   : > { %525 = vmatpush.bf16.msra.mxu0 %v2200_v6  ;;  %2229 = vmatpush.bf16.msra.mxu3 %v2200_v6  ;;  %v1925_v6 = vld [vmem:[%s2628_s25] sm:$0xf] }
  0x6b   : > { %526 = vmatpush.bf16.msra.mxu0 %v2199_v7  ;;  %2230 = vmatpush.bf16.msra.mxu3 %v2199_v7  ;;  %v2152_v7 = vld [vmem:[%s2628_s25 + $0x4] sm:$0xf0] }
  0x6e   : > { %527 = vmatmul.bf16.vlgmr.msra.gmra.mxu0 %v2183_v8  ;;  %587 = vmatmul.bf16.vlgmr.msra.gmra.mxu3 %v2195_v9  ;;  %v2682_v8 = vor.u32 %v2152_v7, %v1925_v6  ;;  %v2684_v9 = vor.u32 %v2178_v5, %v2029_v4  ;;  %v2161_v5 = vld [vmem:[%s2628_s25 + $0x54] sm:$0xf]  ;;  %v1967_v6 = vld [vmem:[%s2628_s25 + $0x58] sm:$0xf0]  ;;  %v1981_v7 = vld [vmem:[%s2628_s25 + $0x70] sm:$0xf] }
  0x7e   : > { %532 = vmatmul.bf16.gmra.mxu0 %v2184_v10  ;;  %592 = vmatmul.bf16.gmra.mxu3 %v2196_v11  ;;  %v1933_v11 = vld [vmem:[%s2628_s25 + $0x10] sm:$0xf] }
  0x8e   : > { %537 = vmatmul.bf16.gmra.mxu0 %v2185_v12  ;;  %597 = vmatmul.bf16.gmra.mxu3 %v2197_v13  ;;  %v2154_v12 = vld [vmem:[%s2628_s25 + $0x14] sm:$0xf0] }
  0x9e   : > { %542 = vmatmul.bf16.gmra.mxu0 %v2186_v14  ;;  %602 = vmatmul.bf16.gmra.mxu3 %v2198_v15  ;;  %v2690_v14 = vor.u32 %v2154_v12, %v1933_v11  ;;  %v2037_v15 = vld [vmem:[%s2628_s25 + $0xe0] sm:$0xf]  ;;  %v2780_v12 = vor.u32 %v2161_v5, %v1967_v6 }
  0xae   : > { %547 = vmatmul.bf16.gmra.mxu0 %v2187_v16  ;;  %v2180_v16 = vld [vmem:[%s2628_s25 + $0xe4] sm:$0xf0] }
  0xbe   : > { %552 = vmatmul.bf16.gmra.mxu0 %v2188_v17  ;;  %v2694_v17 = vor.u32 %v2180_v16, %v2037_v15  ;;  %v2213_v16 = vld [vmem:[#allocation6 + $0x70] sm:$0xff] }
  0xce   : > { %557 = vmatmul.bf16.gmra.mxu0 %v2189_v18 }
  0xde   : > { %562 = vmatmul.bf16.gmra.mxu0 %v2190_v19 }
  0xeb   : > { %v2662_v21 = vpop.f32.mrf.mxu0 }
  0xee   : > { %567 = vmatmul.bf16.gmra.mxu0 %v2191_v20 }
  0xf1   : > { %v588_v23 = vpop.f32.mrf.mxu3 }
  0xf3   : > { %v2664_v22 = vpop.f32.mrf.mxu0 }
  0xf4   : > { %v608_v0 = vpack.c.bf16 %v2664_v22, %v2662_v21  ;;  %v1941_v21 = vld [vmem:[%s2628_s25 + $0x20] sm:$0xf]  ;;  %v2156_v22 = vld [vmem:[%s2628_s25 + $0x24] sm:$0xf0] }
  0xf9   : > { %v590_v26 = vpop.f32.mrf.mxu3 }
  0xfa   : > { %v620_v46 = vpack.c.bf16 %v590_v26, %v588_v23  ;;  %v2182_v26 = vld [vmem:[%s2628_s25 + $0xf4] sm:$0xf0] }
  0xfb   : > { %v533_v25 = vpop.f32.mrf.mxu0 }
  0xfe   : > { %572 = vmatmul.bf16.gmra.mxu0 %v2192_v24  ;;  %v2045_v24 = vld [vmem:[%s2628_s25 + $0xf0] sm:$0xf] }
 0x101   : > { %v593_v28 = vpop.f32.mrf.mxu3 }
 0x103   : > { %v535_v27 = vpop.f32.mrf.mxu0 }
 0x104   : > { %v609_v61 = vpack.c.bf16 %v535_v27, %v533_v25  ;;  %v2701_v25 = vor.u32 %v2156_v22, %v1941_v21  ;;  %v2151_v27 = vld [vmem:[%s2628_s25 + $0x4] sm:$0xf]  ;;  %v2212_v21 = vld [vmem:[#allocation6 + $0x68] sm:$0xff]  ;;  %v1989_v22 = vld [vmem:[%s2628_s25 + $0x80] sm:$0xf] }
 0x109   : > { %v595_v31 = vpop.f32.mrf.mxu3 }
 0x10a   : > { %v621_v44 = vpack.c.bf16 %v595_v31, %v593_v28  ;;  %v1927_v28 = vld [vmem:[%s2628_s25 + $0x8] sm:$0xf0] }
 0x10b   : > { %v538_v30 = vpop.f32.mrf.mxu0  ;;  %v2709_v31 = vor.u32 %v2151_v27, %v1927_v28  ;;  %v2211_v28 = vld [vmem:[#allocation6 + $0x60] sm:$0xff] }
 0x10e   : > { %577 = vmatmul.bf16.gmra.mxu0 %v2193_v29 }
 0x111   : > { %v598_v33 = vpop.f32.mrf.mxu3 }
 0x113   : > { %v540_v32 = vpop.f32.mrf.mxu0 }
 0x114   : > { %v610_v59 = vpack.c.bf16 %v540_v32, %v538_v30  ;;  %v2707_v30 = vor.u32 %v2182_v26, %v2045_v24  ;;  %v1949_v32 = vld [vmem:[%s2628_s25 + $0x30] sm:$0xf] }
 0x119   : > { %v600_v36 = vpop.f32.mrf.mxu3 }
 0x11a   : > { %v622_v43 = vpack.c.bf16 %v600_v36, %v598_v33  ;;  %v2158_v33 = vld [vmem:[%s2628_s25 + $0x34] sm:$0xf0]  ;;  %v1935_v36 = vld [vmem:[%s2628_s25 + $0x18] sm:$0xf0] }
 0x11b   : > { %v543_v35 = vpop.f32.mrf.mxu0 }
 0x11e   : > { %582 = vmatmul.bf16.gmra.mxu0 %v2194_v34  ;;  %v2153_v34 = vld [vmem:[%s2628_s25 + $0x14] sm:$0xf] }
 0x121   : > { %v603_v38 = vpop.f32.mrf.mxu3 }
 0x123   : > { %v545_v37 = vpop.f32.mrf.mxu0 }
 0x124   : > { %v611_v58 = vpack.c.bf16 %v545_v37, %v543_v35  ;;  %v2717_v35 = vor.u32 %v2158_v33, %v1949_v32  ;;  %v2175_v37 = vld [vmem:[%s2628_s25 + $0xc4] sm:$0xf]  ;;  %v2210_v32 = vld [vmem:[#allocation6 + $0x58] sm:$0xff] }
 0x129   : > { %v605_v40 = vpop.f32.mrf.mxu3 }
 0x12a   : > { %v623_v41 = vpack.c.bf16 %v605_v40, %v603_v38  ;;  %v2023_v38 = vld [vmem:[%s2628_s25 + $0xc8] sm:$0xf0] }
 0x12b   : > { %v548_v39 = vpop.f32.mrf.mxu0  ;;  %v2724_v40 = vor.u32 %v2175_v37, %v2023_v38  ;;  %v1983_v37 = vld [vmem:[%s2628_s25 + $0x78] sm:$0xf0] }
 0x12c   : > { %875 = vmatpush.bf16.msra.mxu2 %v623_v41 }
 0x12d   : > { %3171 = vst [vmem:[#allocation13_spill] sm:$0xff] %v2724_v40 }
 0x130   : > { %876 = vmatpush.bf16.msra.mxu2 %v622_v43 }
 0x133   : > { %v550_v42 = vpop.f32.mrf.mxu0 }
 0x134   : > { %877 = vmatpush.bf16.msra.mxu2 %v621_v44  ;;  %v612_v56 = vpack.c.bf16 %v550_v42, %v548_v39  ;;  %v2722_v39 = vor.u32 %v2153_v34, %v1935_v36  ;;  %v2160_v42 = vld [vmem:[%s2628_s25 + $0x44] sm:$0xf0]  ;;  %v2209_v34 = vld [vmem:[#allocation6 + $0x50] sm:$0xff] }
 0x135   : > { %v2165_v36 = vld [vmem:[%s2628_s25 + $0x74] sm:$0xf] }
 0x138   : > { %878 = vmatpush.bf16.msra.mxu2 %v620_v46 }
 0x13b   : > { %v553_v45 = vpop.f32.mrf.mxu0 }
 0x143   : > { %v555_v47 = vpop.f32.mrf.mxu0 }
 0x144   : > { %v613_v55 = vpack.c.bf16 %v555_v47, %v553_v45  ;;  %v1943_v45 = vld [vmem:[%s2628_s25 + $0x28] sm:$0xf0]  ;;  %v2031_v47 = vld [vmem:[%s2628_s25 + $0xd8] sm:$0xf0] }
 0x14b   : > { %v558_v48 = vpop.f32.mrf.mxu0 }
 0x153   : > { %v560_v49 = vpop.f32.mrf.mxu0 }
 0x154   : > { %v614_v53 = vpack.c.bf16 %v560_v49, %v558_v48 }
 0x15b   : > { %v563_v50 = vpop.f32.mrf.mxu0 }
 0x163   : > { %v565_v51 = vpop.f32.mrf.mxu0 }
 0x164   : > { %v615_v52 = vpack.c.bf16 %v565_v51, %v563_v50  ;;  %v1965_v50 = vld [vmem:[%s2628_s25 + $0x50] sm:$0xf]  ;;  %v2162_v51 = vld [vmem:[%s2628_s25 + $0x54] sm:$0xf0] }
 0x166   : > { %786 = vmatpush.bf16.msra.mxu1 %v615_v52  ;;  %2231 = vmatpush.bf16.msrb.mxu3 %v615_v52  ;;  %v2157_v52 = vld [vmem:[%s2628_s25 + $0x34] sm:$0xf] }
 0x16a   : > { %787 = vmatpush.bf16.msra.mxu1 %v614_v53  ;;  %2232 = vmatpush.bf16.msrb.mxu3 %v614_v53  ;;  %v2747_v53 = vor.u32 %v2162_v51, %v1965_v50  ;;  %v2207_v50 = vld [vmem:[#allocation6 + $0x40] sm:$0xff] }
 0x16b   : > { %v2669_v54 = vpop.f32.mrf.mxu0 }
 0x16e   : > { %788 = vmatpush.bf16.msra.mxu1 %v613_v55  ;;  %2233 = vmatpush.bf16.msrb.mxu3 %v613_v55  ;;  %v2179_v55 = vld [vmem:[%s2628_s25 + $0xe4] sm:$0xf] }
 0x172   : > { %789 = vmatpush.bf16.msra.mxu1 %v612_v56  ;;  %2234 = vmatpush.bf16.msrb.mxu3 %v612_v56  ;;  %v2039_v56 = vld [vmem:[%s2628_s25 + $0xe8] sm:$0xf0] }
 0x173   : > { %v570_v57 = vpop.f32.mrf.mxu0 }
 0x174   : > { %v616_v29 = vpack.c.bf16 %v570_v57, %v2669_v54  ;;  %v1951_v54 = vld [vmem:[%s2628_s25 + $0x38] sm:$0xf0] }
 0x175   : > { %v2752_v57 = vor.u32 %v2157_v52, %v1951_v54  ;;  %v2167_v54 = vld [vmem:[%s2628_s25 + $0x84] sm:$0xf] }
 0x176   : > { %790 = vmatpush.bf16.msra.mxu1 %v611_v58  ;;  %2235 = vmatpush.bf16.msrb.mxu3 %v611_v58  ;;  %v2754_v58 = vor.u32 %v2179_v55, %v2039_v56  ;;  %v1991_v55 = vld [vmem:[%s2628_s25 + $0x88] sm:$0xf0] }
 0x178   : > { %3173 = vst [vmem:[#allocation15_spill] sm:$0xff] %v2754_v58 }
 0x17a   : > { %791 = vmatpush.bf16.msra.mxu1 %v610_v59  ;;  %2236 = vmatpush.bf16.msrb.mxu3 %v610_v59  ;;  %v2159_v59 = vld [vmem:[%s2628_s25 + $0x44] sm:$0xf] }
 0x17b   : > { %v573_v60 = vpop.f32.mrf.mxu0 }
 0x17e   : > { %792 = vmatpush.bf16.msra.mxu1 %v609_v61  ;;  %2237 = vmatpush.bf16.msrb.mxu3 %v609_v61  ;;  %v2181_v61 = vld [vmem:[%s2628_s25 + $0xf4] sm:$0xf] }
 0x17f   : > { %v2769_v4 = vor.u32 %v2181_v61, %v2047_v62 }
 0x181   : > { %3174 = vst [vmem:[#allocation16_spill] sm:$0xff] %v2769_v4 }
 0x182   : > { %793 = vmatpush.bf16.msra.mxu1 %v608_v0  ;;  %2238 = vmatpush.bf16.msrb.mxu3 %v608_v0  ;;  %v2164_v0 = vld [vmem:[%s2628_s25 + $0x64] sm:$0xf0] }
 0x183   : > { %v575_v2 = vpop.f32.mrf.mxu0 }
 0x184   : > { %v617_v23 = vpack.c.bf16 %v575_v2, %v573_v60  ;;  %v1959_v60 = vld [vmem:[%s2628_s25 + $0x48] sm:$0xf0]  ;;  %v2765_v2 = vor.u32 %v2164_v0, %v1973_v63  ;;  %v2822_v63 = vor.u32 %v2167_v54, %v1991_v55  ;;  %v2826_v0 = vld [vmem:[#allocation7] ss:$0 sm:$0xff] }
 0x185   : > { %854 = vmatmul.bf16.vlgmr.msrb.gmra.mxu3 %v2675_v1  ;;  %794 = vmatmul.bf16.vlgmr.msra.gmra.mxu1 %v2682_v8 }
 0x186   : > { %2239 = vmatpush.bf16.msra.mxu3 %v623_v41  ;;  %v1957_v41 = vld [vmem:[%s2628_s25 + $0x40] sm:$0xf] }
 0x18a   : > { %2240 = vmatpush.bf16.msra.mxu3 %v622_v43  ;;  %v2155_v43 = vld [vmem:[%s2628_s25 + $0x24] sm:$0xf] }
 0x18b   : > { %v578_v3 = vpop.f32.mrf.mxu0  ;;  %v2737_v48 = vor.u32 %v2155_v43, %v1943_v45  ;;  %v2170_v43 = vld [vmem:[%s2628_s25 + $0x94] sm:$0xf0] }
 0x18e   : > { %2241 = vmatpush.bf16.msra.mxu3 %v621_v44  ;;  %v2732_v44 = vor.u32 %v2160_v42, %v1957_v41  ;;  %v2208_v41 = vld [vmem:[#allocation6 + $0x48] sm:$0xff]  ;;  %v1997_v42 = vld [vmem:[%s2628_s25 + $0x90] sm:$0xf] }
 0x18f   : > { %v2804_v45 = vor.u32 %v2170_v43, %v1997_v42 }
 0x192   : > { %2242 = vmatpush.bf16.msra.mxu3 %v620_v46  ;;  %v2177_v46 = vld [vmem:[%s2628_s25 + $0xd4] sm:$0xf] }
 0x193   : > { %v580_v10 = vpop.f32.mrf.mxu0  ;;  %v2739_v49 = vor.u32 %v2177_v46, %v2031_v47  ;;  %v2808_v47 = vor.u32 %v2165_v36, %v1983_v37 }
 0x194   : > { %v618_v20 = vpack.c.bf16 %v580_v10, %v578_v3  ;;  %v2767_v3 = vor.u32 %v2159_v59, %v1959_v60  ;;  %v2166_v10 = vld [vmem:[%s2628_s25 + $0x74] sm:$0xf0]  ;;  %v2005_v59 = vld [vmem:[%s2628_s25 + $0xa0] sm:$0xf]  ;;  %v2172_v60 = vld [vmem:[%s2628_s25 + $0xa4] sm:$0xf0] }
 0x195   : > { %859 = vmatmul.bf16.gmra.mxu3 %v2684_v9  ;;  %799 = vmatmul.bf16.gmra.mxu1 %v2690_v14  ;;  %3172 = vst [vmem:[#allocation14_spill] sm:$0xff] %v2739_v49  ;;  %v2778_v11 = vor.u32 %v2166_v10, %v1981_v7  ;;  %v2818_v61 = vor.u32 %v2172_v60, %v2005_v59  ;;  %v2171_v60 = vld [vmem:[%s2628_s25 + $0xa4] sm:$0xf] }
 0x19b   : > { %v583_v13 = vpop.f32.mrf.mxu0 }
 0x1a3   : > { %v585_v18 = vpop.f32.mrf.mxu0 }
 0x1a4   : > { %v619_v19 = vpack.c.bf16 %v585_v18, %v583_v13  ;;  %v2214_v13 = vld [vmem:[#allocation6 + $0x78] sm:$0xff]  ;;  %v2163_v18 = vld [vmem:[%s2628_s25 + $0x64] sm:$0xf] }
 0x1a5   : > { %864 = vmatmul.bf16.gmra.mxu3 %v2694_v17  ;;  %804 = vmatmul.bf16.gmra.mxu1 %v2701_v25 }
 0x1a6   : > { %879 = vmatpush.bf16.msra.mxu2 %v619_v19  ;;  %2243 = vmatpush.bf16.msra.mxu3 %v619_v19  ;;  %v1975_v19 = vld [vmem:[%s2628_s25 + $0x68] sm:$0xf0] }
 0x1a7   : > { %v2794_v27 = vor.u32 %v2163_v18, %v1975_v19  ;;  %v2013_v18 = vld [vmem:[%s2628_s25 + $0xb0] sm:$0xf]  ;;  %v2174_v19 = vld [vmem:[%s2628_s25 + $0xb4] sm:$0xf0] }
 0x1aa   : > { %880 = vmatpush.bf16.msra.mxu2 %v618_v20  ;;  %2244 = vmatpush.bf16.msra.mxu3 %v618_v20 }
 0x1ae   : > { %881 = vmatpush.bf16.msra.mxu2 %v617_v23  ;;  %2245 = vmatpush.bf16.msra.mxu3 %v617_v23  ;;  %v2168_v23 = vld [vmem:[%s2628_s25 + $0x84] sm:$0xf0] }
 0x1af   : > { %v2790_v24 = vor.u32 %v2168_v23, %v1989_v22  ;;  %v2836_v23 = vor.u32 %v2174_v19, %v2013_v18 }
 0x1b2   : > { %882 = vmatpush.bf16.msra.mxu2 %v616_v29  ;;  %2246 = vmatpush.bf16.msra.mxu3 %v616_v29 }
 0x1b5   : > { %869 = vmatmul.bf16.gmra.mxu3 %v2707_v30  ;;  %883 = vmatmul.bf16.vlgmr.msra.gmra.mxu2 %v2709_v31 }
 0x1b6   : > { %809 = vmatmul.bf16.gmra.mxu1 %v2717_v35  ;;  %1077 = vmatpush.bf16.msrb.mxu3 %v2214_v13  ;;  %v2169_v13 = vld [vmem:[%s2628_s25 + $0x94] sm:$0xf] }
 0x1ba   : > { %1078 = vmatpush.bf16.msrb.mxu3 %v2213_v16  ;;  %v1999_v16 = vld [vmem:[%s2628_s25 + $0x98] sm:$0xf0] }
 0x1bb   : > { %v2840_v36 = vor.u32 %v2169_v13, %v1999_v16 }
 0x1be   : > { %1079 = vmatpush.bf16.msrb.mxu3 %v2212_v21 }
 0x1c2   : > { %1080 = vmatpush.bf16.msrb.mxu3 %v2211_v28 }
 0x1c5   : > { %888 = vmatmul.bf16.gmra.mxu2 %v2722_v39  ;;  %943 = vmatmul.bf16.vlgmr.msra.gmra.mxu3 %v2724_v40 }
 0x1c6   : > { %814 = vmatmul.bf16.gmra.mxu1 %v2732_v44  ;;  %1081 = vmatpush.bf16.msrb.mxu3 %v2210_v32 }
 0x1ca   : > { %1082 = vmatpush.bf16.msrb.mxu3 %v2209_v34 }
 0x1ce   : > { %1083 = vmatpush.bf16.msrb.mxu3 %v2208_v41 }
 0x1d2   : > { %1084 = vmatpush.bf16.msrb.mxu3 %v2207_v50 }
 0x1d5   : > { %893 = vmatmul.bf16.gmra.mxu2 %v2737_v48  ;;  %948 = vmatmul.bf16.gmra.mxu3 %v2739_v49 }
 0x1d6   : > { %819 = vmatmul.bf16.gmra.mxu1 %v2747_v53 }
 0x1e5   : > { %898 = vmatmul.bf16.gmra.mxu2 %v2752_v57  ;;  %953 = vmatmul.bf16.gmra.mxu3 %v2754_v58 }
 0x1e6   : > { %824 = vmatmul.bf16.gmra.mxu1 %v2765_v2 }
 0x1f5   : > { %903 = vmatmul.bf16.gmra.mxu2 %v2767_v3  ;;  %958 = vmatmul.bf16.gmra.mxu3 %v2769_v4 }
 0x1f6   : > { %829 = vmatmul.bf16.gmra.mxu1 %v2778_v11 }
 0x202   : > { %v795_v20 = vpop.f32.mrf.mxu1 }
 0x203   : > { %v796_v10 = vadd.f32 %v2826_v0, %v795_v20 }
 0x205   : > { %908 = vmatmul.bf16.gmra.mxu2 %v2780_v12 }
 0x206   : > { %834 = vmatmul.bf16.gmra.mxu1 %v2790_v24 }
 0x208   : > { %v2784_v15 = vpop.f32.mrf.mxu3 }
 0x209   : > { %v856_v42 = vadd.f32 %v2826_v0, %v2784_v15 }
 0x20a   : > { %v797_v29 = vpop.f32.mrf.mxu1 }
 0x20b   : > { %v798_v21 = vadd.f32 %v2826_v0, %v797_v29 }
 0x210   : > { %v2792_v26 = vpop.f32.mrf.mxu3 }
 0x212   : > { %v800_v38 = vpop.f32.mrf.mxu1 }
 0x213   : > { %v801_v55 = vadd.f32 %v2826_v0, %v800_v38 }
 0x215   : > { %913 = vmatmul.bf16.gmra.mxu2 %v2794_v27 }
 0x216   : > { %839 = vmatmul.bf16.gmra.mxu1 %v2804_v45 }
 0x218   : > { %v2798_v33 = vpop.f32.mrf.mxu3 }
 0x21a   : > { %v802_v51 = vpop.f32.mrf.mxu1 }
 0x220   : > { %v2806_v46 = vpop.f32.mrf.mxu3 }
 0x222   : > { %v805_v56 = vpop.f32.mrf.mxu1 }
 0x225   : > { %918 = vmatmul.bf16.gmra.mxu2 %v2808_v47 }
 0x226   : > { %844 = vmatmul.bf16.gmra.mxu1 %v2818_v61 }
 0x228   : > { %v2812_v52 = vpop.f32.mrf.mxu3 }
 0x22a   : > { %v807_v5 = vpop.f32.mrf.mxu1 }
 0x230   : > { %v2820_v62 = vpop.f32.mrf.mxu3 }
 0x233   : > { %v810_v37 = vpop.f32.mrf.mxu1 }
 0x235   : > { %923 = vmatmul.bf16.gmra.mxu2 %v2822_v63 }
 0x236   : > { %849 = vmatmul.bf16.gmra.mxu1 %v2836_v23 }
 0x238   : > { %v2828_v6 = vpop.f32.mrf.mxu3  ;;  %v884_v7 = vpop.f32.mrf.mxu2 }
 0x239   : > { %v885_v22 = vadd.f32 %v884_v7, %v796_v10  ;;  %v2007_v7 = vld [vmem:[%s2628_s25 + $0xa8] sm:$0xf0]  ;;  %v803_v10 = vadd.f32 %v2826_v0, %v802_v51 }
 0x23a   : > { %v2854_v19 = vor.u32 %v2171_v60, %v2007_v7 }
 0x23b   : > { %v964_v20 = vmax.f32 %v885_v22, 0.0  ;;  %v812_v59 = vpop.f32.mrf.mxu1 }
 0x240   : > { %v2838_v28 = vpop.f32.mrf.mxu3  ;;  %v886_v32 = vpop.f32.mrf.mxu2 }
 0x241   : > { %v887_v34 = vadd.f32 %v886_v32, %v798_v21  ;;  %v861_v32 = vadd.f32 %v2826_v0, %v2798_v33 }
 0x243   : > { %v965_v41 = vmax.f32 %v887_v34, 0.0  ;;  %v815_v34 = vpop.f32.mrf.mxu1 }
 0x245   : > { %v996_v29 = vpack.c.bf16 %v965_v41, %v964_v20  ;;  %928 = vmatmul.bf16.gmra.mxu2 %v2840_v36 }
 0x247   : > { %1085 = vmatmul.bf16.vlgmr.msrb.gmra.mxu3 %v996_v29  ;;  %v2173_v29 = vld [vmem:[%s2628_s25 + $0xb4] sm:$0xf] }
 0x248   : > { %v889_v43 = vpop.f32.mrf.mxu2  ;;  %v944_v50 = vpop.f32.mrf.mxu3 }
 0x249   : > { %v2846_v54 = vadd.f32 %v944_v50, %v856_v42  ;;  %v890_v13 = vadd.f32 %v889_v43, %v801_v55  ;;  %v806_v42 = vadd.f32 %v2826_v0, %v805_v56  ;;  %v2015_v43 = vld [vmem:[%s2628_s25 + $0xb8] sm:$0xf0]  ;;  %v808_v50 = vadd.f32 %v2826_v0, %v807_v5 }
 0x24b   : > { %v966_v21 = vmax.f32 %v890_v13, 0.0  ;;  %v817_v60 = vpop.f32.mrf.mxu1  ;;  %v2867_v13 = vor.u32 %v2173_v29, %v2015_v43 }
 0x250   : > { %v891_v16 = vpop.f32.mrf.mxu2  ;;  %v2852_v15 = vpop.f32.mrf.mxu3 }
 0x251   : > { %v892_v18 = vadd.f32 %v891_v16, %v803_v10 }
 0x253   : > { %v967_v22 = vmax.f32 %v892_v18, 0.0 }
 0x255   : > { %933 = vmatmul.bf16.gmra.mxu2 %v2854_v19  ;;  %v997_v38 = vpack.c.bf16 %v967_v22, %v966_v21  ;;  %v866_v21 = vadd.f32 %v2826_v0, %v2812_v52 }
 0x257   : > { %1090 = vmatmul.bf16.gmra.mxu3 %v997_v38  ;;  %v820_v38 = vpop.f32.mrf.mxu1 }
 0x258   : > { %v894_v51 = vpop.f32.mrf.mxu2  ;;  %v949_v20 = vpop.f32.mrf.mxu3 }
 0x259   : > { %v2859_v41 = vadd.f32 %v949_v20, %v861_v32  ;;  %v895_v55 = vadd.f32 %v894_v51, %v806_v42  ;;  %v811_v51 = vadd.f32 %v2826_v0, %v810_v37  ;;  %v813_v20 = vadd.f32 %v2826_v0, %v812_v59 }
 0x25a   : > { %v816_v37 = vadd.f32 %v2826_v0, %v815_v34 }
 0x25b   : > { %v968_v16 = vmax.f32 %v895_v55, 0.0 }
 0x260   : > { %v896_v7 = vpop.f32.mrf.mxu2  ;;  %v2865_v10 = vpop.f32.mrf.mxu3 }
 0x261   : > { %v897_v33 = vadd.f32 %v896_v7, %v808_v50  ;;  %v822_v7 = vpop.f32.mrf.mxu1 }
 0x263   : > { %v969_v18 = vmax.f32 %v897_v33, 0.0  ;;  %v871_v33 = vadd.f32 %v2826_v0, %v2828_v6 }
 0x265   : > { %938 = vmatmul.bf16.gmra.mxu2 %v2867_v13  ;;  %v998_v56 = vpack.c.bf16 %v969_v18, %v968_v16 }
 0x267   : > { %1095 = vmatmul.bf16.gmra.mxu3 %v998_v56 }
 0x268   : > { %v899_v22 = vpop.f32.mrf.mxu2  ;;  %v954_v32 = vpop.f32.mrf.mxu3 }
 0x269   : > { %v2872_v5 = vadd.f32 %v954_v32, %v866_v21  ;;  %v900_v42 = vadd.f32 %v899_v22, %v811_v51  ;;  %v825_v59 = vpop.f32.mrf.mxu1  ;;  %v818_v22 = vadd.f32 %v2826_v0, %v817_v60 }
 0x26b   : > { %v970_v55 = vmax.f32 %v900_v42, 0.0 }
 0x270   : > { %v901_v29 = vpop.f32.mrf.mxu2  ;;  %v2876_v43 = vpop.f32.mrf.mxu3 }
 0x271   : > { %v902_v50 = vadd.f32 %v901_v29, %v813_v20  ;;  %v827_v6 = vpop.f32.mrf.mxu1 }
 0x273   : > { %v971_v52 = vmax.f32 %v902_v50, 0.0 }
 0x275   : > { %v999_v16 = vpack.c.bf16 %v971_v52, %v970_v55  ;;  %v821_v55 = vadd.f32 %v2826_v0, %v820_v38  ;;  %v823_v52 = vadd.f32 %v2826_v0, %v822_v7 }
 0x277   : > { %1100 = vmatmul.bf16.gmra.mxu3 %v999_v16 }
 0x278   : > { %v904_v18 = vpop.f32.mrf.mxu2  ;;  %v959_v21 = vpop.f32.mrf.mxu3 }
 0x279   : > { %v2880_v56 = vadd.f32 %v959_v21, %v871_v33  ;;  %v905_v32 = vadd.f32 %v904_v18, %v816_v37  ;;  %v830_v34 = vpop.f32.mrf.mxu1  ;;  %v826_v37 = vadd.f32 %v2826_v0, %v825_v59 }
 0x27b   : > { %v972_v42 = vmax.f32 %v905_v32, 0.0  ;;  %v828_v32 = vadd.f32 %v2826_v0, %v827_v6 }
 0x280   : > { %v906_v51 = vpop.f32.mrf.mxu2 }
 0x281   : > { %v907_v20 = vadd.f32 %v906_v51, %v818_v22  ;;  %v832_v22 = vpop.f32.mrf.mxu1 }
 0x283   : > { %v973_v29 = vmax.f32 %v907_v20, 0.0 }
 0x285   : > { %v1000_v50 = vpack.c.bf16 %v973_v29, %v972_v42 }
 0x287   : > { %1105 = vmatmul.bf16.gmra.mxu3 %v1000_v50 }
 0x288   : > { %v909_v4 = vpop.f32.mrf.mxu2 }
 0x289   : > { %v910_v33 = vadd.f32 %v909_v4, %v821_v55  ;;  %v835_v4 = vpop.f32.mrf.mxu1  ;;  %v831_v55 = vadd.f32 %v2826_v0, %v830_v34  ;;  %v2892_v34 = vpop.f32.mrf.mxu3 }
 0x28b   : > { %v974_v58 = vmax.f32 %v910_v33, 0.0 }
 0x290   : > { %v911_v16 = vpop.f32.mrf.mxu2 }
 0x291   : > { %v912_v21 = vadd.f32 %v911_v16, %v823_v52  ;;  %v837_v33 = vpop.f32.mrf.mxu1 }
 0x293   : > { %v975_v49 = vmax.f32 %v912_v21, 0.0 }
 0x295   : > { %v1001_v60 = vpack.c.bf16 %v975_v49, %v974_v58  ;;  %v833_v49 = vadd.f32 %v2826_v0, %v832_v22 }
 0x297   : > { %1110 = vmatmul.bf16.gmra.mxu3 %v1001_v60 }
 0x298   : > { %v914_v18 = vpop.f32.mrf.mxu2 }
 0x299   : > { %v915_v51 = vadd.f32 %v914_v18, %v826_v37  ;;  %v840_v18 = vpop.f32.mrf.mxu1  ;;  %v836_v37 = vadd.f32 %v2826_v0, %v835_v4 }
 0x29b   : > { %v976_v38 = vmax.f32 %v915_v51, 0.0 }
 0x2a0   : > { %v916_v20 = vpop.f32.mrf.mxu2 }
 0x2a1   : > { %v917_v42 = vadd.f32 %v916_v20, %v828_v32  ;;  %v838_v32 = vadd.f32 %v2826_v0, %v837_v33 }
 0x2a3   : > { %v977_v29 = vmax.f32 %v917_v42, 0.0 }
 0x2a5   : > { %v1002_v7 = vpack.c.bf16 %v977_v29, %v976_v38  ;;  %v842_v29 = vpop.f32.mrf.mxu1 }
 0x2a6   : > { %v843_v4 = vadd.f32 %v2826_v0, %v842_v29 }
 0x2a7   : > { %1115 = vmatmul.bf16.gmra.mxu3 %v1002_v7 }
 0x2a8   : > { %v919_v50 = vpop.f32.mrf.mxu2 }
 0x2a9   : > { %v920_v58 = vadd.f32 %v919_v50, %v831_v55 }
 0x2ab   : > { %v978_v16 = vmax.f32 %v920_v58, 0.0 }
 0x2ad   : > { %v845_v58 = vpop.f32.mrf.mxu1 }
 0x2b0   : > { %v921_v52 = vpop.f32.mrf.mxu2 }
 0x2b1   : > { %v922_v59 = vadd.f32 %v921_v52, %v833_v49  ;;  %v841_v49 = vadd.f32 %v2826_v0, %v840_v18  ;;  %v846_v18 = vadd.f32 %v2826_v0, %v845_v58 }
 0x2b3   : > { %v979_v21 = vmax.f32 %v922_v59, 0.0 }
 0x2b5   : > { %v1003_v6 = vpack.c.bf16 %v979_v21, %v978_v16 }
 0x2b7   : > { %1120 = vmatmul.bf16.gmra.mxu3 %v1003_v6 }
 0x2b8   : > { %v924_v60 = vpop.f32.mrf.mxu2 }
 0x2b9   : > { %v925_v51 = vadd.f32 %v924_v60, %v836_v37 }
 0x2bb   : > { %v980_v22 = vmax.f32 %v925_v51, 0.0 }
 0x2c0   : > { %v926_v20 = vpop.f32.mrf.mxu2 }
 0x2c1   : > { %v927_v42 = vadd.f32 %v926_v20, %v838_v32  ;;  %v847_v32 = vpop.f32.mrf.mxu1 }
 0x2c3   : > { %v981_v38 = vmax.f32 %v927_v42, 0.0  ;;  %v848_v42 = vadd.f32 %v2826_v0, %v847_v32 }
 0x2c5   : > { %v1004_v7 = vpack.c.bf16 %v981_v38, %v980_v22 }
 0x2c7   : > { %1125 = vmatmul.bf16.gmra.mxu3 %v1004_v7 }
 0x2c8   : > { %v929_v50 = vpop.f32.mrf.mxu2 }
 0x2c9   : > { %v930_v52 = vadd.f32 %v929_v50, %v841_v49  ;;  %v850_v7 = vpop.f32.mrf.mxu1 }
 0x2ca   : > { %v2894_v55 = vpop.f32.mrf.mxu3 }
 0x2cb   : > { %v982_v21 = vmax.f32 %v930_v52, 0.0  ;;  %v988_v52 = vmax.f32 %v2846_v54, 0.0 }
 0x2d0   : > { %v931_v33 = vpop.f32.mrf.mxu2 }
 0x2d1   : > { %v932_v59 = vadd.f32 %v931_v33, %v843_v4  ;;  %v852_v58 = vpop.f32.mrf.mxu1 }
 0x2d2   : > { %v2898_v16 = vpop.f32.mrf.mxu3 }
 0x2d3   : > { %v983_v6 = vmax.f32 %v932_v59, 0.0 }
 0x2d5   : > { %v1005_v37 = vpack.c.bf16 %v983_v6, %v982_v21  ;;  %v851_v6 = vadd.f32 %v2826_v0, %v850_v7 }
 0x2d7   : > { %1130 = vmatmul.bf16.gmra.mxu3 %v1005_v37  ;;  %v853_v37 = vadd.f32 %v2826_v0, %v852_v58 }
 0x2d8   : > { %v934_v51 = vpop.f32.mrf.mxu2 }
 0x2d9   : > { %v935_v22 = vadd.f32 %v934_v51, %v846_v18 }
 0x2da   : > { %v2902_v20 = vpop.f32.mrf.mxu3 }
 0x2db   : > { %v984_v49 = vmax.f32 %v935_v22, 0.0 }
 0x2e0   : > { %v936_v38 = vpop.f32.mrf.mxu2 }
 0x2e1   : > { %v937_v29 = vadd.f32 %v936_v38, %v848_v42 }
 0x2e2   : > { %v2906_v50 = vpop.f32.mrf.mxu3 }
 0x2e3   : > { %v985_v4 = vmax.f32 %v937_v29, 0.0 }
 0x2e5   : > { %v1006_v33 = vpack.c.bf16 %v985_v4, %v984_v49  ;;  %v858_v49 = vadd.f32 %v2826_v0, %v2792_v26 }
 0x2e7   : > { %1135 = vmatmul.bf16.gmra.mxu3 %v1006_v33  ;;  %v947_v4 = vadd.f32 %v2852_v15, %v858_v49 }
 0x2e8   : > { %v939_v59 = vpop.f32.mrf.mxu2 }
 0x2e9   : > { %v940_v32 = vadd.f32 %v939_v59, %v851_v6  ;;  %v989_v33 = vmax.f32 %v947_v4, 0.0  ;;  %v994_v4 = vmax.f32 %v2880_v56, 0.0  ;;  %v3175_v56 = vpack.c.bf16 %v2906_v50, %v2902_v20 }
 0x2ea   : > { %v1096_v21 = vpop.f32.mrf.mxu3 }
 0x2eb   : > { %v986_v38 = vmax.f32 %v940_v32, 0.0  ;;  %v1008_v59 = vpack.c.bf16 %v989_v33, %v988_v52 }
 0x2f0   : > { %v941_v51 = vpop.f32.mrf.mxu2 }
 0x2f1   : > { %v942_v18 = vadd.f32 %v941_v51, %v853_v37  ;;  %v863_v37 = vadd.f32 %v2826_v0, %v2806_v46  ;;  %v990_v51 = vmax.f32 %v2859_v41, 0.0 }
 0x2f2   : > { %v1098_v42 = vpop.f32.mrf.mxu3 }
 0x2f3   : > { %v987_v60 = vmax.f32 %v942_v18, 0.0  ;;  %v1168_v22 = vpack.c.bf16 %v1098_v42, %v1096_v21  ;;  %v868_v18 = vadd.f32 %v2826_v0, %v2820_v62  ;;  %v992_v42 = vmax.f32 %v2872_v5, 0.0 }
 0x2f5   : > { %v1007_v29 = vpack.c.bf16 %v987_v60, %v986_v38  ;;  %v952_v60 = vadd.f32 %v2865_v10, %v863_v37  ;;  %v873_v10 = vadd.f32 %v2826_v0, %v2838_v28 }
 0x2f7   : > { %1140 = vmatmul.bf16.gmra.mxu3 %v1007_v29  ;;  %v991_v21 = vmax.f32 %v952_v60, 0.0  ;;  %v962_v41 = vadd.f32 %v2892_v34, %v873_v10 }
 0x2f9   : > { %v1009_v26 = vpack.c.bf16 %v991_v21, %v990_v51  ;;  %v995_v29 = vmax.f32 %v962_v41, 0.0  ;;  %v3176_v21 = vpack.c.bf16 %v2898_v16, %v2894_v55 }
 0x2fa   : > { %v1101_v40 = vpop.f32.mrf.mxu3 }
 0x2fb   : > { %v1011_v33 = vpack.c.bf16 %v995_v29, %v994_v4 }
 0x302   : > { %v1103_v7 = vpop.f32.mrf.mxu3 }
 0x303   : > { %v1169_v58 = vpack.c.bf16 %v1103_v7, %v1101_v40  ;;  %v957_v40 = vadd.f32 %v2876_v43, %v868_v18 }
 0x305   : > { %v993_v54 = vmax.f32 %v957_v40, 0.0 }
 0x307   : > { %1145 = vmatmul.bf16.gmra.mxu3 %v1008_v59  ;;  %v1010_v38 = vpack.c.bf16 %v993_v54, %v992_v42 }
 0x30a   : > { %v1106_v6 = vpop.f32.mrf.mxu3 }
 0x312   : > { %v1108_v32 = vpop.f32.mrf.mxu3 }
 0x313   : > { %v1170_v60 = vpack.c.bf16 %v1108_v32, %v1106_v6 }
 0x317   : > { %1150 = vmatmul.bf16.gmra.mxu3 %v1009_v26 }
 0x31a   : > { %v1111_v15 = vpop.f32.mrf.mxu3 }
 0x322   : > { %v1113_v52 = vpop.f32.mrf.mxu3 }
 0x323   : > { %v1171_v37 = vpack.c.bf16 %v1113_v52, %v1111_v15  ;;  %v2222_v52 = vld [vmem:[#allocation6 + $0xb8] sm:$0xff] }
 0x324   : > { %1477 = vmatpush.bf16.msrb.mxu2 %v2222_v52 }
 0x327   : > { %1155 = vmatmul.bf16.gmra.mxu3 %v1010_v38  ;;  %v2221_v38 = vld [vmem:[#allocation6 + $0xb0] sm:$0xff] }
 0x328   : > { %1478 = vmatpush.bf16.msrb.mxu2 %v2221_v38  ;;  %v3177_v38 = vld [vmem:[#allocation13_spill] sm:$0xff] }
 0x32a   : > { %v1116_v46 = vpop.f32.mrf.mxu3 }
 0x332   : > { %v1118_v49 = vpop.f32.mrf.mxu3 }
 0x333   : > { %v1172_v59 = vpack.c.bf16 %v1118_v49, %v1116_v46 }
 0x337   : > { %1160 = vmatmul.bf16.gmra.mxu3 %v1011_v33 }
 0x33a   : > { %v1121_v62 = vpop.f32.mrf.mxu3 }
 0x342   : > { %v1123_v43 = vpop.f32.mrf.mxu3 }
 0x343   : > { %v1173_v7 = vpack.c.bf16 %v1123_v43, %v1121_v62 }
 0x345   : > { %1184 = vmatpush.bf16.msrb.mxu0 %v1173_v7 }
 0x349   : > { %1185 = vmatpush.bf16.msrb.mxu0 %v1172_v59 }
 0x34a   : > { %v1126_v5 = vpop.f32.mrf.mxu3 }
 0x34d   : > { %1186 = vmatpush.bf16.msrb.mxu0 %v1171_v37 }
 0x351   : > { %1187 = vmatpush.bf16.msrb.mxu0 %v1170_v60 }
 0x352   : > { %v1128_v0 = vpop.f32.mrf.mxu3 }
 0x353   : > { %v1174_v28 = vpack.c.bf16 %v1128_v0, %v1126_v5 }
 0x355   : > { %1188 = vmatpush.bf16.msrb.mxu0 %v1169_v58 }
 0x359   : > { %1189 = vmatpush.bf16.msrb.mxu0 %v1168_v22 }
 0x35a   : > { %v1131_v34 = vpop.f32.mrf.mxu3 }
 0x35d   : > { %1190 = vmatpush.bf16.msrb.mxu0 %v3175_v56 }
 0x361   : > { %1191 = vmatpush.bf16.msrb.mxu0 %v3176_v21 }
 0x362   : > { %v1133_v51 = vpop.f32.mrf.mxu3 }
 0x363   : > { %v1175_v26 = vpack.c.bf16 %v1133_v51, %v1131_v34 }
 0x364   : > { %1192 = vmatmul.bf16.vlgmr.msrb.gmra.mxu0 %v2682_v8 }
 0x36a   : > { %v1136_v15 = vpop.f32.mrf.mxu3 }
 0x372   : > { %v1138_v6 = vpop.f32.mrf.mxu3 }
 0x373   : > { %v1176_v32 = vpack.c.bf16 %v1138_v6, %v1136_v15 }
 0x374   : > { %1197 = vmatmul.bf16.gmra.mxu0 %v2690_v14 }
 0x37a   : > { %v1141_v58 = vpop.f32.mrf.mxu3 }
 0x382   : > { %v1143_v22 = vpop.f32.mrf.mxu3 }
 0x383   : > { %v1177_v18 = vpack.c.bf16 %v1143_v22, %v1141_v58 }
 0x384   : > { %1202 = vmatmul.bf16.gmra.mxu0 %v2701_v25 }
 0x38a   : > { %v1146_v20 = vpop.f32.mrf.mxu3 }
 0x392   : > { %v1148_v50 = vpop.f32.mrf.mxu3 }
 0x394   : > { %1207 = vmatmul.bf16.gmra.mxu0 %v2717_v35  ;;  %v2220_v35 = vld [vmem:[#allocation6 + $0xa8] sm:$0xff] }
 0x395   : > { %1479 = vmatpush.bf16.msrb.mxu2 %v2220_v35 }
 0x39a   : > { %v1151_v55 = vpop.f32.mrf.mxu3 }
 0x3a2   : > { %v1153_v16 = vpop.f32.mrf.mxu3 }
 0x3a3   : > { %v1179_v46 = vpack.c.bf16 %v1153_v16, %v1151_v55 }
 0x3a4   : > { %1212 = vmatmul.bf16.gmra.mxu0 %v2732_v44  ;;  %v1178_v44 = vpack.c.bf16 %v1148_v50, %v1146_v20 }
 0x3aa   : > { %v1156_v40 = vpop.f32.mrf.mxu3 }
 0x3b2   : > { %v1158_v8 = vpop.f32.mrf.mxu3 }
 0x3b3   : > { %v1180_v25 = vpack.c.bf16 %v1158_v8, %v1156_v40 }
 0x3b4   : > { %1217 = vmatmul.bf16.gmra.mxu0 %v2747_v53  ;;  %v2219_v53 = vld [vmem:[#allocation6 + $0xa0] sm:$0xff] }
 0x3b5   : > { %1480 = vmatpush.bf16.msrb.mxu2 %v2219_v53 }
 0x3ba   : > { %v1161_v54 = vpop.f32.mrf.mxu3 }
 0x3c2   : > { %v1163_v14 = vpop.f32.mrf.mxu3 }
 0x3c3   : > { %v1181_v42 = vpack.c.bf16 %v1163_v14, %v1161_v54 }
 0x3c4   : > { %1222 = vmatmul.bf16.gmra.mxu0 %v2765_v2  ;;  %v2218_v2 = vld [vmem:[#allocation6 + $0x98] sm:$0xff] }
 0x3c5   : > { %1273 = vmatpush.bf16.msrb.mxu1 %v1181_v42  ;;  %1481 = vmatpush.bf16.msrb.mxu2 %v2218_v2 }
 0x3c9   : > { %1274 = vmatpush.bf16.msrb.mxu1 %v1180_v25 }
 0x3cd   : > { %1275 = vmatpush.bf16.msrb.mxu1 %v1179_v46 }
 0x3d1   : > { %1276 = vmatpush.bf16.msrb.mxu1 %v1178_v44 }
 0x3d4   : > { %1227 = vmatmul.bf16.gmra.mxu0 %v2778_v11  ;;  %v2217_v11 = vld [vmem:[#allocation6 + $0x90] sm:$0xff] }
 0x3d5   : > { %1277 = vmatpush.bf16.msrb.mxu1 %v1177_v18  ;;  %1482 = vmatpush.bf16.msrb.mxu2 %v2217_v11 }
 0x3d9   : > { %1278 = vmatpush.bf16.msrb.mxu1 %v1176_v32 }
 0x3dd   : > { %1279 = vmatpush.bf16.msrb.mxu1 %v1175_v26 }
 0x3e1   : > { %1280 = vmatpush.bf16.msrb.mxu1 %v1174_v28 }
 0x3e4   : > { %1281 = vmatmul.bf16.vlgmr.msrb.gmra.mxu1 %v2709_v31  ;;  %1232 = vmatmul.bf16.gmra.mxu0 %v2790_v24  ;;  %v2216_v31 = vld [vmem:[#allocation6 + $0x88] sm:$0xff] }
 0x3e5   : > { %1483 = vmatpush.bf16.msrb.mxu2 %v2216_v31 }
 0x3f4   : > { %1286 = vmatmul.bf16.gmra.mxu1 %v2722_v39  ;;  %1237 = vmatmul.bf16.gmra.mxu0 %v2804_v45  ;;  %v1193_v39 = vpop.f32.mrf.mxu0  ;;  %v2215_v45 = vld [vmem:[#allocation6 + $0x80] sm:$0xff] }
 0x3f5   : > { %1484 = vmatpush.bf16.msrb.mxu2 %v2215_v45 }
 0x3fc   : > { %v1195_v24 = vpop.f32.mrf.mxu0 }
 0x404   : > { %1291 = vmatmul.bf16.gmra.mxu1 %v2737_v48  ;;  %1242 = vmatmul.bf16.gmra.mxu0 %v2818_v61  ;;  %v1198_v48 = vpop.f32.mrf.mxu0 }
 0x414   : > { %1296 = vmatmul.bf16.gmra.mxu1 %v2752_v57  ;;  %1247 = vmatmul.bf16.gmra.mxu0 %v2836_v23  ;;  %v1200_v57 = vpop.f32.mrf.mxu0  ;;  %v2957_v23 = vld [vmem:[#allocation7 + $0x1] ss:$0 sm:$0xff] }
 0x415   : > { %v1194_v10 = vadd.f32 %v2957_v23, %v1193_v39  ;;  %v1196_v41 = vadd.f32 %v2957_v23, %v1195_v24  ;;  %v1199_v62 = vadd.f32 %v2957_v23, %v1198_v48  ;;  %v1201_v7 = vadd.f32 %v2957_v23, %v1200_v57  ;;  %v3178_v24 = vld [vmem:[#allocation14_spill] sm:$0xff] }
 0x41c   : > { %v1203_v61 = vpop.f32.mrf.mxu0 }
 0x424   : > { %1301 = vmatmul.bf16.gmra.mxu1 %v2767_v3  ;;  %1252 = vmatmul.bf16.gmra.mxu0 %v2675_v1  ;;  %v1205_v3 = vpop.f32.mrf.mxu0 }
 0x42c   : > { %v1208_v1 = vpop.f32.mrf.mxu0 }
 0x42d   : > { %v1209_v18 = vadd.f32 %v2957_v23, %v1208_v1 }
 0x434   : > { %1306 = vmatmul.bf16.gmra.mxu1 %v2780_v12  ;;  %1257 = vmatmul.bf16.gmra.mxu0 %v2684_v9  ;;  %v1210_v33 = vpop.f32.mrf.mxu0 }
 0x43c   : > { %v1213_v43 = vpop.f32.mrf.mxu0 }
 0x43d   : > { %v1214_v42 = vadd.f32 %v2957_v23, %v1213_v43 }
 0x444   : > { %1311 = vmatmul.bf16.gmra.mxu1 %v2794_v27  ;;  %1262 = vmatmul.bf16.gmra.mxu0 %v2694_v17  ;;  %v1215_v28 = vpop.f32.mrf.mxu0 }
 0x445   : > { %v1216_v35 = vadd.f32 %v2957_v23, %v1215_v28 }
 0x44c   : > { %v1218_v56 = vpop.f32.mrf.mxu0 }
 0x44d   : > { %v1219_v39 = vadd.f32 %v2957_v23, %v1218_v56 }
 0x454   : > { %1316 = vmatmul.bf16.gmra.mxu1 %v2808_v47  ;;  %1267 = vmatmul.bf16.gmra.mxu0 %v2707_v30  ;;  %v1204_v30 = vadd.f32 %v2957_v23, %v1203_v61  ;;  %v1220_v58 = vpop.f32.mrf.mxu0 }
 0x455   : > { %v1221_v57 = vadd.f32 %v2957_v23, %v1220_v58 }
 0x45c   : > { %v1223_v20 = vpop.f32.mrf.mxu0 }
 0x461   : > { %v1282_v12 = vpop.f32.mrf.mxu1 }
 0x462   : > { %v1283_v27 = vadd.f32 %v1282_v12, %v1194_v10 }
 0x464   : > { %1321 = vmatmul.bf16.gmra.mxu1 %v2822_v63  ;;  %v1362_v9 = vmax.f32 %v1283_v27, 0.0  ;;  %v1225_v14 = vpop.f32.mrf.mxu0 }
 0x469   : > { %v1284_v29 = vpop.f32.mrf.mxu1 }
 0x46a   : > { %v1285_v49 = vadd.f32 %v1284_v29, %v1196_v41  ;;  %v1224_v29 = vadd.f32 %v2957_v23, %v1223_v20 }
 0x46c   : > { %v1363_v4 = vmax.f32 %v1285_v49, 0.0  ;;  %v1228_v44 = vpop.f32.mrf.mxu0  ;;  %v3179_v49 = vld [vmem:[#allocation15_spill] sm:$0xff] }
 0x46e   : > { %v1394_v47 = vpack.c.bf16 %v1363_v4, %v1362_v9  ;;  %v1226_v4 = vadd.f32 %v2957_v23, %v1225_v14 }
 0x470   : > { %1485 = vmatmul.bf16.vlgmr.msrb.gmra.mxu2 %v1394_v47 }
 0x471   : > { %v1287_v17 = vpop.f32.mrf.mxu1 }
 0x472   : > { %v1288_v63 = vadd.f32 %v1287_v17, %v1199_v62 }
 0x474   : > { %1326 = vmatmul.bf16.gmra.mxu1 %v2840_v36  ;;  %v1364_v37 = vmax.f32 %v1288_v63, 0.0  ;;  %v1206_v36 = vadd.f32 %v2957_v23, %v1205_v3  ;;  %v1230_v48 = vpop.f32.mrf.mxu0 }
 0x479   : > { %v1289_v59 = vpop.f32.mrf.mxu1 }
 0x47a   : > { %v1290_v5 = vadd.f32 %v1289_v59, %v1201_v7 }
 0x47c   : > { %v1365_v60 = vmax.f32 %v1290_v5, 0.0  ;;  %v1233_v27 = vpop.f32.mrf.mxu0  ;;  %v1229_v5 = vadd.f32 %v2957_v23, %v1228_v44 }
 0x47e   : > { %v1395_v0 = vpack.c.bf16 %v1365_v60, %v1364_v37  ;;  %v3180_v37 = vld [vmem:[#allocation16_spill] sm:$0xff] }
 0x480   : > { %1490 = vmatmul.bf16.gmra.mxu2 %v1395_v0  ;;  %v1231_v0 = vadd.f32 %v2957_v23, %v1230_v48 }
 0x481   : > { %v1292_v34 = vpop.f32.mrf.mxu1 }
 0x482   : > { %v1293_v21 = vadd.f32 %v1292_v34, %v1204_v30 }
 0x484   : > { %1331 = vmatmul.bf16.gmra.mxu1 %v2854_v19  ;;  %v1366_v15 = vmax.f32 %v1293_v21, 0.0  ;;  %v1211_v19 = vadd.f32 %v2957_v23, %v1210_v33  ;;  %v1235_v33 = vpop.f32.mrf.mxu0 }
 0x489   : > { %v1294_v51 = vpop.f32.mrf.mxu1 }
 0x48a   : > { %v1295_v26 = vadd.f32 %v1294_v51, %v1206_v36 }
 0x48c   : > { %v1367_v6 = vmax.f32 %v1295_v26, 0.0  ;;  %v1238_v59 = vpop.f32.mrf.mxu0  ;;  %v1234_v26 = vadd.f32 %v2957_v23, %v1233_v27 }
 0x48e   : > { %v1396_v32 = vpack.c.bf16 %v1367_v6, %v1366_v15 }
 0x490   : > { %1495 = vmatmul.bf16.gmra.mxu2 %v1396_v32  ;;  %v1236_v32 = vadd.f32 %v2957_v23, %v1235_v33 }
 0x491   : > { %v1297_v22 = vpop.f32.mrf.mxu1 }
 0x492   : > { %v1298_v50 = vadd.f32 %v1297_v22, %v1209_v18  ;;  %v1566_v18 = vlaneseq }
 0x494   : > { %1336 = vmatmul.bf16.gmra.mxu1 %v2867_v13  ;;  %v1368_v40 = vmax.f32 %v1298_v50, 0.0  ;;  %v1240_v21 = vpop.f32.mrf.mxu0 }
 0x499   : > { %v1299_v55 = vpop.f32.mrf.mxu1 }
 0x49a   : > { %v1300_v16 = vadd.f32 %v1299_v55, %v1211_v19  ;;  %v1567_v55 = vand.u32 127, %v1566_v18 }
 0x49c   : > { %v1369_v8 = vmax.f32 %v1300_v16, 0.0  ;;  %v1243_v15 = vpop.f32.mrf.mxu0  ;;  %v2987_v16 = vld [vmem:[#allocation7 + $0x2] ss:$0 sm:$0xff]  ;;  %vm1568_vm0 = vcmp.ge.s32.totalorder %v1567_v55, 8  ;;  %vm1569_vm1 = vcmp.lt.s32.totalorder %v1567_v55, 16 }
 0x49d   : > { %vm2991_vm2 = vmand %vm1568_vm0, %vm1569_vm1 }
 0x49e   : > { %v1397_v54 = vpack.c.bf16 %v1369_v8, %v1368_v40 }
 0x4a0   : > { %1500 = vmatmul.bf16.gmra.mxu2 %v1397_v54 }
 0x4a1   : > { %v1302_v52 = vpop.f32.mrf.mxu1 }
 0x4a2   : > { %v1303_v25 = vadd.f32 %v1302_v52, %v1214_v42  ;;  %v1239_v52 = vadd.f32 %v2957_v23, %v1238_v59 }
 0x4a4   : > { %1341 = vmatmul.bf16.gmra.mxu1 %v3177_v38  ;;  %v1370_v53 = vmax.f32 %v1303_v25, 0.0  ;;  %v1245_v8 = vpop.f32.mrf.mxu0 }
 0x4a9   : > { %v1304_v13 = vpop.f32.mrf.mxu1 }
 0x4aa   : > { %v1305_v46 = vadd.f32 %v1304_v13, %v1216_v35  ;;  %v1241_v13 = vadd.f32 %v2957_v23, %v1240_v21 }
 0x4ac   : > { %v1371_v2 = vmax.f32 %v1305_v46, 0.0 }
 0x4ae   : > { %v1398_v11 = vpack.c.bf16 %v1371_v2, %v1370_v53  ;;  %v1248_v2 = vpop.f32.mrf.mxu0 }
 0x4b0   : > { %1505 = vmatmul.bf16.gmra.mxu2 %v1398_v11 }
 0x4b1   : > { %v1307_v31 = vpop.f32.mrf.mxu1 }
 0x4b2   : > { %v1308_v45 = vadd.f32 %v1307_v31, %v1219_v39 }
 0x4b4   : > { %1346 = vmatmul.bf16.gmra.mxu1 %v3178_v24  ;;  %v1372_v12 = vmax.f32 %v1308_v45, 0.0 }
 0x4b9   : > { %v1309_v61 = vpop.f32.mrf.mxu1 }
 0x4ba   : > { %v1310_v3 = vadd.f32 %v1309_v61, %v1221_v57 }
 0x4bc   : > { %v1373_v10 = vmax.f32 %v1310_v3, 0.0  ;;  %v1244_v3 = vadd.f32 %v2957_v23, %v1243_v15 }
 0x4be   : > { %v1399_v1 = vpack.c.bf16 %v1373_v10, %v1372_v12  ;;  %v1250_v10 = vpop.f32.mrf.mxu0 }
 0x4c0   : > { %1510 = vmatmul.bf16.gmra.mxu2 %v1399_v1 }
 0x4c1   : > { %v1312_v41 = vpop.f32.mrf.mxu1 }
 0x4c2   : > { %v1313_v9 = vadd.f32 %v1312_v41, %v1224_v29  ;;  %v1246_v29 = vadd.f32 %v2957_v23, %v1245_v8 }
 0x4c4   : > { %1351 = vmatmul.bf16.gmra.mxu1 %v3179_v49  ;;  %v1374_v62 = vmax.f32 %v1313_v9, 0.0 }
 0x4c9   : > { %v1314_v47 = vpop.f32.mrf.mxu1 }
 0x4ca   : > { %v1315_v17 = vadd.f32 %v1314_v47, %v1226_v4 }
 0x4cc   : > { %v1375_v43 = vmax.f32 %v1315_v17, 0.0 }
 0x4ce   : > { %v1400_v63 = vpack.c.bf16 %v1375_v43, %v1374_v62 }
 0x4d0   : > { %1515 = vmatmul.bf16.gmra.mxu2 %v1400_v63  ;;  %v1253_v63 = vpop.f32.mrf.mxu0 }
 0x4d1   : > { %v1317_v7 = vpop.f32.mrf.mxu1 }
 0x4d2   : > { %v1318_v60 = vadd.f32 %v1317_v7, %v1229_v5 }
 0x4d4   : > { %1356 = vmatmul.bf16.gmra.mxu1 %v3180_v37  ;;  %v1376_v30 = vmax.f32 %v1318_v60, 0.0  ;;  %v1249_v37 = vadd.f32 %v2957_v23, %v1248_v2 }
 0x4d8   : > { %v1255_v21 = vpop.f32.mrf.mxu0 }
 0x4d9   : > { %v1319_v28 = vpop.f32.mrf.mxu1 }
 0x4da   : > { %v1320_v34 = vadd.f32 %v1319_v28, %v1231_v0 }
 0x4dc   : > { %v1377_v56 = vmax.f32 %v1320_v34, 0.0 }
 0x4de   : > { %v1401_v36 = vpack.c.bf16 %v1377_v56, %v1376_v30  ;;  %v1251_v30 = vadd.f32 %v2957_v23, %v1250_v10 }
 0x4e0   : > { %1520 = vmatmul.bf16.gmra.mxu2 %v1401_v36 }
 0x4e1   : > { %v1322_v51 = vpop.f32.mrf.mxu1 }
 0x4e2   : > { %v1323_v6 = vadd.f32 %v1322_v51, %v1234_v26 }
 0x4e4   : > { %v1378_v20 = vmax.f32 %v1323_v6, 0.0 }
 0x4e9   : > { %v1324_v58 = vpop.f32.mrf.mxu1 }
 0x4ea   : > { %v1325_v22 = vadd.f32 %v1324_v58, %v1236_v32 }
 0x4ec   : > { %v1379_v50 = vmax.f32 %v1325_v22, 0.0 }
 0x4ee   : > { %v1402_v19 = vpack.c.bf16 %v1379_v50, %v1378_v20  ;;  %v1258_v50 = vpop.f32.mrf.mxu0 }
 0x4f0   : > { %1525 = vmatmul.bf16.gmra.mxu2 %v1402_v19  ;;  %v1254_v19 = vadd.f32 %v2957_v23, %v1253_v63 }
 0x4f1   : > { %v1327_v40 = vpop.f32.mrf.mxu1 }
 0x4f2   : > { %v1328_v25 = vadd.f32 %v1327_v40, %v1239_v52  ;;  %v1256_v52 = vadd.f32 %v2957_v23, %v1255_v21 }
 0x4f3   : > { %v1486_v54 = vpop.f32.mrf.mxu2 }
 0x4f4   : > { %v1487_v14 = vadd.f32 %v2987_v16, %v1486_v54  ;;  %v1380_v11 = vmax.f32 %v1328_v25, 0.0 }
 0x4f6   : > { %v2115_v38 = vclamps-f32 %v1487_v14, 10.0 }
 0x4f8   : > { %v1635_v35 = vsel %vm2991_vm2, %v2115_v38, %v1487_v14 }
 0x4f9   : > { %1667 = vst [vmem:[%s2998_s6] sm:$0xff] %v1635_v35  ;;  %v1329_v46 = vpop.f32.mrf.mxu1 }
 0x4fa   : > { %v1330_v44 = vadd.f32 %v1329_v46, %v1241_v13 }
 0x4fb   : > { %v1488_v53 = vpop.f32.mrf.mxu2 }
 0x4fc   : > { %v1381_v31 = vmax.f32 %v1330_v44, 0.0  ;;  %v1489_v39 = vadd.f32 %v2987_v16, %v1488_v53  ;;  %v1260_v44 = vpop.f32.mrf.mxu0 }
 0x4fe   : > { %v1403_v24 = vpack.c.bf16 %v1381_v31, %v1380_v11  ;;  %v2116_v48 = vclamps-f32 %v1489_v39, 10.0 }
 0x500   : > { %v1636_v45 = vsel %vm2991_vm2, %v2116_v48, %v1489_v39  ;;  %1530 = vmatmul.bf16.gmra.mxu2 %v1403_v24  ;;  %v1259_v24 = vadd.f32 %v2957_v23, %v1258_v50 }
 0x501   : > { %1668 = vst [vmem:[%s2998_s6 + $0x8] sm:$0xff] %v1636_v45  ;;  %v1332_v57 = vpop.f32.mrf.mxu1 }
 0x502   : > { %v1333_v27 = vadd.f32 %v1332_v57, %v1244_v3 }
 0x503   : > { %v1491_v61 = vpop.f32.mrf.mxu2 }
 0x504   : > { %v1492_v12 = vadd.f32 %v2987_v16, %v1491_v61  ;;  %v1382_v47 = vmax.f32 %v1333_v27, 0.0  ;;  %v1263_v57 = vpop.f32.mrf.mxu0 }
 0x506   : > { %v2117_v1 = vclamps-f32 %v1492_v12, 10.0 }
 0x508   : > { %v1637_v41 = vsel %vm2991_vm2, %v2117_v1, %v1492_v12  ;;  %v1261_v12 = vadd.f32 %v2957_v23, %v1260_v44 }
 0x509   : > { %1669 = vst [vmem:[%s2998_s6 + $0x10] sm:$0xff] %v1637_v41  ;;  %v1334_v49 = vpop.f32.mrf.mxu1 }
 0x50a   : > { %v1335_v9 = vadd.f32 %v1334_v49, %v1246_v29 }
 0x50b   : > { %v1493_v4 = vpop.f32.mrf.mxu2 }
 0x50c   : > { %v1383_v33 = vmax.f32 %v1335_v9, 0.0  ;;  %v1494_v17 = vadd.f32 %v2987_v16, %v1493_v4 }
 0x50e   : > { %v1404_v62 = vpack.c.bf16 %v1383_v33, %v1382_v47  ;;  %v2118_v43 = vclamps-f32 %v1494_v17, 10.0 }
 0x510   : > { %v1638_v7 = vsel %vm2991_vm2, %v2118_v43, %v1494_v17  ;;  %1535 = vmatmul.bf16.gmra.mxu2 %v1404_v62  ;;  %v1265_v17 = vpop.f32.mrf.mxu0  ;;  %v1264_v43 = vadd.f32 %v2957_v23, %v1263_v57 }
 0x511   : > { %1670 = vst [vmem:[%s2998_s6 + $0x18] sm:$0xff] %v1638_v7  ;;  %v1337_v59 = vpop.f32.mrf.mxu1 }
 0x512   : > { %v1338_v28 = vadd.f32 %v1337_v59, %v1249_v37  ;;  %v1266_v37 = vadd.f32 %v2957_v23, %v1265_v17 }
 0x513   : > { %v1496_v5 = vpop.f32.mrf.mxu2 }
 0x514   : > { %v1497_v60 = vadd.f32 %v2987_v16, %v1496_v5  ;;  %v1384_v26 = vmax.f32 %v1338_v28, 0.0 }
 0x516   : > { %v2119_v0 = vclamps-f32 %v1497_v60, 10.0 }
 0x518   : > { %v1639_v34 = vsel %vm2991_vm2, %v2119_v0, %v1497_v60 }
 0x519   : > { %1671 = vst [vmem:[%s2998_s6 + $0x20] sm:$0xff] %v1639_v34  ;;  %v1339_v56 = vpop.f32.mrf.mxu1  ;;  %v1268_v34 = vpop.f32.mrf.mxu0 }
 0x51a   : > { %v1340_v36 = vadd.f32 %v1339_v56, %v1251_v30 }
 0x51b   : > { %v1498_v51 = vpop.f32.mrf.mxu2 }
 0x51c   : > { %v1385_v15 = vmax.f32 %v1340_v36, 0.0  ;;  %v1499_v6 = vadd.f32 %v2987_v16, %v1498_v51 }
 0x51e   : > { %v1405_v32 = vpack.c.bf16 %v1385_v15, %v1384_v26  ;;  %v2120_v58 = vclamps-f32 %v1499_v6, 10.0 }
 0x520   : > { %v1640_v22 = vsel %vm2991_vm2, %v2120_v58, %v1499_v6  ;;  %1540 = vmatmul.bf16.gmra.mxu2 %v1405_v32  ;;  %v1269_v32 = vadd.f32 %v2957_v23, %v1268_v34 }
 0x521   : > { %1672 = vst [vmem:[%s2998_s6 + $0x28] sm:$0xff] %v1640_v22  ;;  %v1342_v18 = vpop.f32.mrf.mxu1  ;;  %v1270_v22 = vpop.f32.mrf.mxu0 }
 0x522   : > { %v1343_v8 = vadd.f32 %v1342_v18, %v1254_v19  ;;  %v1271_v19 = vadd.f32 %v2957_v23, %v1270_v22 }
 0x523   : > { %v1501_v20 = vpop.f32.mrf.mxu2 }
 0x524   : > { %v1502_v55 = vadd.f32 %v2987_v16, %v1501_v20  ;;  %v1386_v35 = vmax.f32 %v1343_v8, 0.0 }
 0x526   : > { %v2121_v40 = vclamps-f32 %v1502_v55, 10.0 }
 0x528   : > { %v1641_v54 = vsel %vm2991_vm2, %v2121_v40, %v1502_v55 }
 0x529   : > { %1673 = vst [vmem:[%s2998_s6 + $0x30] sm:$0xff] %v1641_v54  ;;  %v1344_v14 = vpop.f32.mrf.mxu1 }
 0x52a   : > { %v1345_v38 = vadd.f32 %v1344_v14, %v1256_v52 }
 0x52b   : > { %v1503_v25 = vpop.f32.mrf.mxu2 }
 0x52c   : > { %v1387_v13 = vmax.f32 %v1345_v38, 0.0  ;;  %v1504_v46 = vadd.f32 %v2987_v16, %v1503_v25 }
 0x52e   : > { %v1406_v53 = vpack.c.bf16 %v1387_v13, %v1386_v35  ;;  %v2122_v2 = vclamps-f32 %v1504_v46, 10.0 }
 0x530   : > { %v1642_v11 = vsel %vm2991_vm2, %v2122_v2, %v1504_v46  ;;  %1545 = vmatmul.bf16.gmra.mxu2 %v1406_v53 }
 0x531   : > { %1674 = vst [vmem:[%s2998_s6 + $0x38] sm:$0xff] %v1642_v11  ;;  %v1347_v31 = vpop.f32.mrf.mxu1 }
 0x532   : > { %v1348_v61 = vadd.f32 %v1347_v31, %v1259_v24 }
 0x533   : > { %v1506_v39 = vpop.f32.mrf.mxu2 }
 0x534   : > { %v1507_v48 = vadd.f32 %v2987_v16, %v1506_v39  ;;  %v1388_v41 = vmax.f32 %v1348_v61, 0.0 }
 0x536   : > { %v2123_v45 = vclamps-f32 %v1507_v48, 10.0 }
 0x538   : > { %v1643_v3 = vsel %vm2991_vm2, %v2123_v45, %v1507_v48 }
 0x539   : > { %1675 = vst [vmem:[%s2998_s6 + $0x40] sm:$0xff] %v1643_v3  ;;  %v1349_v10 = vpop.f32.mrf.mxu1 }
 0x53a   : > { %v1350_v1 = vadd.f32 %v1349_v10, %v1261_v12 }
 0x53b   : > { %v1508_v27 = vpop.f32.mrf.mxu2 }
 0x53c   : > { %v1389_v29 = vmax.f32 %v1350_v1, 0.0  ;;  %v1509_v49 = vadd.f32 %v2987_v16, %v1508_v27 }
 0x53e   : > { %v1407_v9 = vpack.c.bf16 %v1389_v29, %v1388_v41  ;;  %v2124_v4 = vclamps-f32 %v1509_v49, 10.0 }
 0x540   : > { %v1644_v47 = vsel %vm2991_vm2, %v2124_v4, %v1509_v49  ;;  %1550 = vmatmul.bf16.gmra.mxu2 %v1407_v9 }
 0x541   : > { %1676 = vst [vmem:[%s2998_s6 + $0x48] sm:$0xff] %v1644_v47  ;;  %v1352_v33 = vpop.f32.mrf.mxu1 }
 0x542   : > { %v1353_v59 = vadd.f32 %v1352_v33, %v1264_v43 }
 0x543   : > { %v1511_v62 = vpop.f32.mrf.mxu2 }
 0x544   : > { %v1512_v63 = vadd.f32 %v2987_v16, %v1511_v62  ;;  %v1390_v30 = vmax.f32 %v1353_v59, 0.0 }
 0x546   : > { %v2125_v7 = vclamps-f32 %v1512_v63, 10.0 }
 0x548   : > { %v1645_v5 = vsel %vm2991_vm2, %v2125_v7, %v1512_v63 }
 0x549   : > { %1677 = vst [vmem:[%s2998_s6 + $0x50] sm:$0xff] %v1645_v5  ;;  %v1354_v60 = vpop.f32.mrf.mxu1 }
 0x54a   : > { %v1355_v0 = vadd.f32 %v1354_v60, %v1266_v37 }
 0x54b   : > { %v1513_v28 = vpop.f32.mrf.mxu2 }
 0x54c   : > { %v1391_v56 = vmax.f32 %v1355_v0, 0.0  ;;  %v1514_v21 = vadd.f32 %v2987_v16, %v1513_v28 }
 0x54e   : > { %v1408_v36 = vpack.c.bf16 %v1391_v56, %v1390_v30  ;;  %v2126_v51 = vclamps-f32 %v1514_v21, 10.0 }
 0x550   : > { %v1646_v26 = vsel %vm2991_vm2, %v2126_v51, %v1514_v21  ;;  %1555 = vmatmul.bf16.gmra.mxu2 %v1408_v36 }
 0x551   : > { %1678 = vst [vmem:[%s2998_s6 + $0x58] sm:$0xff] %v1646_v26  ;;  %v1357_v15 = vpop.f32.mrf.mxu1 }
 0x552   : > { %v1358_v20 = vadd.f32 %v1357_v15, %v1269_v32 }
 0x553   : > { %v1516_v6 = vpop.f32.mrf.mxu2 }
 0x554   : > { %v1517_v58 = vadd.f32 %v2987_v16, %v1516_v6  ;;  %v1392_v54 = vmax.f32 %v1358_v20, 0.0 }
 0x556   : > { %v2127_v18 = vclamps-f32 %v1517_v58, 10.0 }
 0x558   : > { %v1647_v50 = vsel %vm2991_vm2, %v2127_v18, %v1517_v58 }
 0x559   : > { %1679 = vst [vmem:[%s2998_s6 + $0x60] sm:$0xff] %v1647_v50  ;;  %v1359_v55 = vpop.f32.mrf.mxu1 }
 0x55a   : > { %v1360_v40 = vadd.f32 %v1359_v55, %v1271_v19 }
 0x55b   : > { %v1518_v8 = vpop.f32.mrf.mxu2 }
 0x55c   : > { %v1393_v52 = vmax.f32 %v1360_v40, 0.0  ;;  %v1519_v14 = vadd.f32 %v2987_v16, %v1518_v8 }
 0x55e   : > { %v1409_v38 = vpack.c.bf16 %v1393_v52, %v1392_v54  ;;  %v2128_v25 = vclamps-f32 %v1519_v14, 10.0 }
 0x560   : > { %v1648_v35 = vsel %vm2991_vm2, %v2128_v25, %v1519_v14  ;;  %1560 = vmatmul.bf16.gmra.mxu2 %v1409_v38 }
 0x561   : > { %1680 = vst [vmem:[%s2998_s6 + $0x68] sm:$0xff] %v1648_v35 }
 0x563   : > { %v1521_v13 = vpop.f32.mrf.mxu2 }
 0x564   : > { %v1522_v23 = vadd.f32 %v2987_v16, %v1521_v13 }
 0x566   : > { %v2129_v46 = vclamps-f32 %v1522_v23, 10.0 }
 0x568   : > { %v1649_v44 = vsel %vm2991_vm2, %v2129_v46, %v1522_v23 }
 0x569   : > { %1681 = vst [vmem:[%s2998_s6 + $0x70] sm:$0xff] %v1649_v44 }
 0x56b   : > { %v1523_v53 = vpop.f32.mrf.mxu2 }
 0x56c   : > { %v1524_v2 = vadd.f32 %v2987_v16, %v1523_v53 }
 0x56e   : > { %v2130_v11 = vclamps-f32 %v1524_v2, 10.0 }
 0x570   : > { %v1650_v31 = vsel %vm2991_vm2, %v2130_v11, %v1524_v2 }
 0x571   : > { %1682 = vst [vmem:[%s2998_s6 + $0x78] sm:$0xff] %v1650_v31 }
 0x573   : > { %v1526_v39 = vpop.f32.mrf.mxu2 }
 0x574   : > { %v1527_v24 = vadd.f32 %v2987_v16, %v1526_v39 }
 0x576   : > { %v2131_v48 = vclamps-f32 %v1527_v24, 10.0 }
 0x578   : > { %v1651_v45 = vsel %vm2991_vm2, %v2131_v48, %v1527_v24 }
 0x579   : > { %1683 = vst [vmem:[%s2998_s6 + $0x80] sm:$0xff] %v1651_v45 }
 0x57b   : > { %v1528_v57 = vpop.f32.mrf.mxu2 }
 0x57c   : > { %v1529_v61 = vadd.f32 %v2987_v16, %v1528_v57 }
 0x57e   : > { %v2132_v3 = vclamps-f32 %v1529_v61, 10.0 }
 0x580   : > { %v1652_v12 = vsel %vm2991_vm2, %v2132_v3, %v1529_v61 }
 0x581   : > { %1684 = vst [vmem:[%s2998_s6 + $0x88] sm:$0xff] %v1652_v12 }
 0x583   : > { %v1531_v10 = vpop.f32.mrf.mxu2 }
 0x584   : > { %v1532_v1 = vadd.f32 %v2987_v16, %v1531_v10 }
 0x586   : > { %v2133_v27 = vclamps-f32 %v1532_v1, 10.0 }
 0x588   : > { %v1653_v41 = vsel %vm2991_vm2, %v2133_v27, %v1532_v1 }
 0x589   : > { %1685 = vst [vmem:[%s2998_s6 + $0x90] sm:$0xff] %v1653_v41 }
 0x58b   : > { %v1533_v29 = vpop.f32.mrf.mxu2 }
 0x58c   : > { %v1534_v49 = vadd.f32 %v2987_v16, %v1533_v29 }
 0x58e   : > { %v2134_v9 = vclamps-f32 %v1534_v49, 10.0 }
 0x590   : > { %v1654_v4 = vsel %vm2991_vm2, %v2134_v9, %v1534_v49 }
 0x591   : > { %1686 = vst [vmem:[%s2998_s6 + $0x98] sm:$0xff] %v1654_v4 }
 0x593   : > { %v1536_v47 = vpop.f32.mrf.mxu2 }
 0x594   : > { %v1537_v33 = vadd.f32 %v2987_v16, %v1536_v47 }
 0x596   : > { %v2135_v17 = vclamps-f32 %v1537_v33, 10.0 }
 0x598   : > { %v1655_v62 = vsel %vm2991_vm2, %v2135_v17, %v1537_v33 }
 0x599   : > { %1687 = vst [vmem:[%s2998_s6 + $0xa0] sm:$0xff] %v1655_v62 }
 0x59b   : > { %v1538_v43 = vpop.f32.mrf.mxu2 }
 0x59c   : > { %v1539_v63 = vadd.f32 %v2987_v16, %v1538_v43 }
 0x59e   : > { %v2136_v7 = vclamps-f32 %v1539_v63, 10.0 }
 0x5a0   : > { %v1656_v59 = vsel %vm2991_vm2, %v2136_v7, %v1539_v63 }
 0x5a1   : > { %1688 = vst [vmem:[%s2998_s6 + $0xa8] sm:$0xff] %v1656_v59 }
 0x5a3   : > { %v1541_v5 = vpop.f32.mrf.mxu2 }
 0x5a4   : > { %v1542_v37 = vadd.f32 %v2987_v16, %v1541_v5 }
 0x5a6   : > { %v2137_v60 = vclamps-f32 %v1542_v37, 10.0 }
 0x5a8   : > { %v1657_v0 = vsel %vm2991_vm2, %v2137_v60, %v1542_v37 }
 0x5a9   : > { %1689 = vst [vmem:[%s2998_s6 + $0xb0] sm:$0xff] %v1657_v0 }
 0x5ab   : > { %v1543_v28 = vpop.f32.mrf.mxu2 }
 0x5ac   : > { %v1544_v34 = vadd.f32 %v2987_v16, %v1543_v28 }
 0x5ae   : > { %v2138_v30 = vclamps-f32 %v1544_v34, 10.0 }
 0x5b0   : > { %v1658_v56 = vsel %vm2991_vm2, %v2138_v30, %v1544_v34 }
 0x5b1   : > { %1690 = vst [vmem:[%s2998_s6 + $0xb8] sm:$0xff] %v1658_v56 }
 0x5b3   : > { %v1546_v21 = vpop.f32.mrf.mxu2 }
 0x5b4   : > { %v1547_v36 = vadd.f32 %v2987_v16, %v1546_v21 }
 0x5b6   : > { %v2139_v51 = vclamps-f32 %v1547_v36, 10.0 }
 0x5b8   : > { %v1659_v26 = vsel %vm2991_vm2, %v2139_v51, %v1547_v36 }
 0x5b9   : > { %1691 = vst [vmem:[%s2998_s6 + $0xc0] sm:$0xff] %v1659_v26 }
 0x5bb   : > { %v1548_v15 = vpop.f32.mrf.mxu2 }
 0x5bc   : > { %v1549_v6 = vadd.f32 %v2987_v16, %v1548_v15 }
 0x5be   : > { %v2140_v32 = vclamps-f32 %v1549_v6, 10.0 }
 0x5c0   : > { %v1660_v58 = vsel %vm2991_vm2, %v2140_v32, %v1549_v6 }
 0x5c1   : > { %1692 = vst [vmem:[%s2998_s6 + $0xc8] sm:$0xff] %v1660_v58 }
 0x5c3   : > { %v1551_v22 = vpop.f32.mrf.mxu2 }
 0x5c4   : > { %v1552_v18 = vadd.f32 %v2987_v16, %v1551_v22 }
 0x5c6   : > { %v2141_v20 = vclamps-f32 %v1552_v18, 10.0 }
 0x5c8   : > { %v1661_v50 = vsel %vm2991_vm2, %v2141_v20, %v1552_v18 }
 0x5c9   : > { %1693 = vst [vmem:[%s2998_s6 + $0xd0] sm:$0xff] %v1661_v50 }
 0x5cb   : > { %v1553_v19 = vpop.f32.mrf.mxu2 }
 0x5cc   : > { %v1554_v55 = vadd.f32 %v2987_v16, %v1553_v19 }
 0x5ce   : > { %v2142_v40 = vclamps-f32 %v1554_v55, 10.0 }
 0x5d0   : > { %v1662_v8 = vsel %vm2991_vm2, %v2142_v40, %v1554_v55 }
 0x5d1   : > { %1694 = vst [vmem:[%s2998_s6 + $0xd8] sm:$0xff] %v1662_v8 }
 0x5d3   : > { %v1556_v54 = vpop.f32.mrf.mxu2 }
 0x5d4   : > { %v1557_v52 = vadd.f32 %v2987_v16, %v1556_v54 }
 0x5d6   : > { %v2143_v14 = vclamps-f32 %v1557_v52, 10.0 }
 0x5d8   : > { %v1663_v38 = vsel %vm2991_vm2, %v2143_v14, %v1557_v52 }
 0x5d9   : > { %1695 = vst [vmem:[%s2998_s6 + $0xe0] sm:$0xff] %v1663_v38 }
 0x5db   : > { %v1558_v25 = vpop.f32.mrf.mxu2 }
 0x5dc   : > { %v1559_v35 = vadd.f32 %v2987_v16, %v1558_v25 }
 0x5de   : > { %v2144_v13 = vclamps-f32 %v1559_v35, 10.0 }
 0x5e0   : > { %v1664_v23 = vsel %vm2991_vm2, %v2144_v13, %v1559_v35 }
 0x5e1   : > { %1696 = vst [vmem:[%s2998_s6 + $0xe8] sm:$0xff] %v1664_v23 }
 0x5e3   : > { %v1561_v46 = vpop.f32.mrf.mxu2 }
 0x5e4   : > { %v1562_v44 = vadd.f32 %v2987_v16, %v1561_v46 }
 0x5e6   : > { %v2145_v53 = vclamps-f32 %v1562_v44, 10.0 }
 0x5e8   : > { %v1665_v2 = vsel %vm2991_vm2, %v2145_v53, %v1562_v44 }
 0x5e9   : > { %1697 = vst [vmem:[%s2998_s6 + $0xf0] sm:$0xff] %v1665_v2 }
 0x5eb   : > { %v1563_v11 = vpop.f32.mrf.mxu2 }
 0x5ec   : > { %v1564_v31 = vadd.f32 %v2987_v16, %v1563_v11 }
 0x5ee   : > { %v2146_v39 = vclamps-f32 %v1564_v31, 10.0 }
 0x5f0   : > { %v1666_v24 = vsel %vm2991_vm2, %v2146_v39, %v1564_v31 }
 0x5f1   : > { %1698 = vst [vmem:[%s2998_s6 + $0xf8] sm:$0xff] %v1666_v24 }
 0x5f2 PF: > { %p18_p4 = scmp.ge.s32.totalorder %s2567_s8, 4   ;;  %s3183_s15 = smov %s2477_s16 }
 0x5f3   : > { %s3184_s16 = smov %s2481_s17  ;;  %s3185_s17 = smov %s2580_s12 }
 0x5f4   : > { %s3186_s18 = smov %s2567_s8  ;;  %20 = sbr.rel (!%p18_p4) target bundleno = 8 (0x8), region = 99 }
 0x5f9   :  { %1721 = vsyncpa [#allocation3], 1 }
 0x5fa   :  { %1723 = vsyncpa [#allocation3 + $0x1], 1 }
 0x5fb   :  { %1724 = vsyncpa [#allocation5], 1 }
 0x5fc   :  { %1726 = vsyncpa [#allocation5 + $0x1], 1 }
 0x5fd   :  { %1727 = vsyncpa [#allocation8], 1 }

</bundles_post_ra>
